<compile_context>
chip_gen: v7x
topology: tpu7x:2x2x1
jax: 0.10.0
libtpu: 0.0.40
codegen_flags: <defaults>
</compile_context>

<pallas_src>
import functools

import jax
import jax.numpy as jnp
from jax.experimental import pallas as pl
from jax.experimental.pallas import tpu as pltpu

EPS = 1e-5


def _round_up(x, m):
    return (x + m - 1) // m * m


def _vmem_capacity_bytes():
    """Physical VMEM for this generation; conservative (v7x) fallback."""
    try:
        info = pltpu.get_tpu_info()
        for attr in ("vmem_capacity_bytes", "vmem_bytes", "vmem_size_bytes"):
            v = getattr(info, attr, None)
            if v:
                return int(v)
    except Exception:
        pass
    return 64 * 1024 * 1024  # v7x has the smallest VMEM -> safe everywhere


def _pick_tn(B, C, N, x_itemsize, out_itemsize, w_itemsize, *, budget_bytes,
             x_bufs=2, out_bufs=2, w_bufs=1, tn_cap=2048):
    """Largest lane-dense (multiple-of-128) sequence tile whose *total* VMEM
    footprint (pipelined x/out blocks + f32 intermediates + resident
    weight/bias) fits the per-generation budget, then trimmed so the
    parallel grid keeps enough steps for megacore sharding."""
    if N <= 128:
        return N
    tn_upper = min((N // 128) * 128, _round_up(tn_cap, 128))

    def need(t):
        blocks = x_bufs * C * t * x_itemsize + out_bufs * C * t * out_itemsize
        f32_tmp = 3 * C * t * 4                      # xf/x_norm, diff, f32 matmul result
        resident = w_bufs * C * C * w_itemsize + 2 * C * 4
        return blocks + f32_tmp + resident + (256 << 10)

    tn = tn_upper
    while tn > 128 and need(tn) > budget_bytes:
        tn -= 128
    # v7x megacore balance: keep >= ~8 parallel grid steps while tiles stay >= 512.
    while tn > 512 and B * (-(-N // tn)) < 8:
        tn -= 128
    return max(tn, 128)


def _prenorm_kernel(x_ref, w_ref, bias_ref, o_ref, *, groups, dim):
    # x_ref: (1, C, TN)  w_ref: (C, C) gamma-folded  bias_ref: (C, 1) beta-folded
    x = x_ref[0]                                        # (C, TN), input dtype
    C, TN = x.shape
    xg = x.astype(jnp.float32).reshape(groups, dim, TN)  # stats in f32

    # Two-pass stats (no cancellation); reductions run on the XLU, which is
    # idle slack in this DMA-bound kernel.
    inv_d = jnp.float32(1.0 / dim)
    mean = jnp.sum(xg, axis=1, keepdims=True) * inv_d          # (G, 1, TN)
    diff = xg - mean                                           # reused for normalisation
    var = jnp.sum(diff * diff, axis=1, keepdims=True) * inv_d  # unbiased=False
    std = jnp.sqrt(var)
    # Exact reciprocal only on the (G, 1, TN) stat rows (nearly free), then a
    # single multiply on the full tile.  Matches (x - mean) / (std + eps).
    inv = pl.reciprocal(std + EPS, approx=False)

    x_norm = (diff * inv).reshape(C, TN)                # gamma/beta folded into W/bias
    y = jnp.dot(w_ref[...], x_norm.astype(w_ref.dtype),
                preferred_element_type=jnp.float32)
    y = y + bias_ref[...]                               # (C, 1) broadcasts over TN
    o_ref[0] = y.astype(o_ref.dtype)


def prenorm(x, g, b, w, bias, *, groups, tn=None, mxu_bf16=None):
    """Fused PreNorm: GroupLayerNorm(x) followed by a pointwise (1x1 Conv1d) fn.

    x: (B, C, N) NCL layout; g, b: GroupLayerNorm affine (any shape flattening
    to C); w: (C, C); bias: conv bias (any shape flattening to C).
    """
    B, C, N = x.shape
    assert C % groups == 0
    dim = C // groups
    # TODO(synk): pad each group's channel dim to a multiple of 8 when dim % 8 != 0.
    assert dim % 8 == 0, "channels-per-group must be a multiple of 8 (f32 sublane tile)"

    # Fold GroupLayerNorm's affine params into the pointwise conv:
    #   W @ ((x - mu)*inv*g + b) + bias = (W*g^T) @ ((x - mu)*inv) + (W@b + bias)
    w32 = w.astype(jnp.float32)
    gcol = g.reshape(C).astype(jnp.float32)
    bcol = b.reshape(C, 1).astype(jnp.float32)
    bias_f = w32 @ bcol + bias.reshape(C, 1).astype(jnp.float32)     # (C, 1) f32
    if mxu_bf16 is None:
        mxu_bf16 = C >= 256      # only where the matmul (not HBM) can bind
    w_dtype = jnp.bfloat16 if (mxu_bf16 and w.dtype == jnp.float32) else w.dtype
    w_f = (w32 * gcol[None, :]).astype(w_dtype)

    x_itemsize = jnp.dtype(x.dtype).itemsize
    w_itemsize = jnp.dtype(w_f.dtype).itemsize

    # Per-generation VMEM: ~48 MiB scoped on v7x (64 MiB physical),
    # ~96 MiB on v5e/v6e (128 MiB physical).
    vmem_limit = min(_vmem_capacity_bytes() * 3 // 4, 100 * 1024 * 1024)

    if tn is None:
        tn = _pick_tn(B, C, N, x_itemsize, x_itemsize, w_itemsize,
                      budget_bytes=vmem_limit * 9 // 10)
    TN = N if N < 128 else max(128, min(_round_up(tn, 128), (N // 128) * 128))

    kernel = functools.partial(_prenorm_kernel, groups=groups, dim=dim)
    grid = (B, pl.cdiv(N, TN))   # no host-side pad: edge blocks handle ragged N

    def call(single_buffer_resident):
        # Constant-index weight/bias stay VMEM-resident; one buffer suffices.
        res_kw = {"pipeline_mode": pl.Buffered(1)} if single_buffer_resident else {}
        return pl.pallas_call(
            kernel,
            out_shape=jax.ShapeDtypeStruct((B, C, N), x.dtype),
            grid_spec=pltpu.PrefetchScalarGridSpec(
                num_scalar_prefetch=0,
                grid=grid,
                in_specs=[
                    pl.BlockSpec((1, C, TN), lambda bi, ni: (bi, 0, ni)),  # x tile
                    pl.BlockSpec((C, C), lambda bi, ni: (0, 0), **res_kw),  # W
                    pl.BlockSpec((C, 1), lambda bi, ni: (0, 0), **res_kw),  # bias
                ],
                out_specs=pl.BlockSpec((1, C, TN), lambda bi, ni: (bi, 0, ni)),
            ),
            compiler_params=pltpu.CompilerParams(
                dimension_semantics=("parallel", "parallel"),
                vmem_limit_bytes=vmem_limit,
            ),
        )(x, w_f, bias_f)

    try:
        return call(True)
    except Exception:
        # Fallback for builds where pipeline_mode on pallas_call BlockSpecs is
        # unsupported; only costs one extra (C, C) VMEM buffer.
        return call(False)


def prenorm_ref(x, g, b, w, bias, *, groups):
    """Pure-JAX reference mirroring the PyTorch module (exact semantics)."""
    B, C, N = x.shape
    dim = C // groups
    xg = x.astype(jnp.float32).reshape(B, groups, dim, N)
    mean = jnp.mean(xg, axis=2, keepdims=True)
    var = jnp.mean((xg - mean) ** 2, axis=2, keepdims=True)      # unbiased=False
    std = jnp.sqrt(var)
    gg = g.reshape(1, groups, dim, 1).astype(jnp.float32)
    bb = b.reshape(1, groups, dim, 1).astype(jnp.float32)
    out = (xg - mean) / (std + EPS) * gg + bb
    out = out.reshape(B, C, N)
    y = jnp.einsum('oc,bcn->bon', w.astype(jnp.float32), out) + bias.reshape(1, C, 1)
    return y.astype(x.dtype)


if __name__ == "__main__":
    # Small shapes; N is deliberately NOT a multiple of 128 to exercise the
    # pad-free ragged-edge path (grid (2, 2), second sequence block partial).
    B, groups, dim, N = 2, 2, 32, 300    # C = 64
    C = groups * dim

    key = jax.random.PRNGKey(0)
    kx, kw, kg, kb = jax.random.split(key, 4)

    x = jax.random.normal(kx, (B, C, N), dtype=jnp.float32)
    # GroupLayerNorm params in the module's (1, groups, dim, 1) layout.
    g = 1.0 + 0.1 * jax.random.normal(kg, (1, groups, dim, 1), dtype=jnp.float32)
    b = 0.1 * jax.random.normal(kb, (1, groups, dim, 1), dtype=jnp.float32)
    # fn (pointwise Conv1d) params.
    w = jax.random.normal(kw, (C, C), dtype=jnp.float32) * 0.05
    bias = jnp.zeros((C,), dtype=jnp.float32)

    out = jax.block_until_ready(prenorm(x, g, b, w, bias, groups=groups))
    ref = prenorm_ref(x, g, b, w, bias, groups=groups)
    assert out.shape == ref.shape

    err = float(jnp.max(jnp.abs(out - ref)))
    assert jnp.allclose(out, ref, atol=2e-3, rtol=2e-3), f"mismatch vs reference: {err}"

    print("KERNEL_OK")
</pallas_src>

<mosaic_0001>
module attributes {stable_mosaic.version = 11 : i64} {
  func.func @_prenorm_kernel(%arg0: i32, %arg1: i32, %arg2: memref<1x64x256xf32, #tpu.memory_space<vmem>>, %arg3: memref<64x64xf32, #tpu.memory_space<vmem>>, %arg4: memref<64x1xf32, #tpu.memory_space<vmem>>, %arg5: memref<1x64x256xf32, #tpu.memory_space<vmem>>) attributes {dimension_semantics = [#tpu.dimension_semantics<parallel>, #tpu.dimension_semantics<parallel>], iteration_bounds = array<i64: 2, 2>, scalar_prefetch = 0 : i64, scratch_operands = 0 : i64, tpu.core_type = #tpu.core_type<tc>, window_params = [{transform_indices = @transform_0, window_bounds = array<i64: 1, 64, 256>}, {pipeline_mode = #tpu.pipeline_mode<synchronous>, transform_indices = @transform_1, window_bounds = array<i64: 64, 64>}, {pipeline_mode = #tpu.pipeline_mode<synchronous>, transform_indices = @transform_2, window_bounds = array<i64: 64, 1>}, {transform_indices = @transform_3, window_bounds = array<i64: 1, 64, 256>}]} {
    %c0 = arith.constant 0 : index
    %c0_0 = arith.constant 0 : index
    %c0_1 = arith.constant 0 : index
    %0 = vector.load %arg2[%c0, %c0_0, %c0_1] : memref<1x64x256xf32, #tpu.memory_space<vmem>>, vector<1x64x256xf32>
    %1 = vector.shape_cast %0 : vector<1x64x256xf32> to vector<64x256xf32>
    %2 = vector.shape_cast %1 : vector<64x256xf32> to vector<2x32x256xf32>
    %cst = arith.constant dense<0.000000e+00> : vector<2x256xf32>
    %3 = vector.multi_reduction <add>, %2, %cst [1] : vector<2x32x256xf32> to vector<2x256xf32>
    %4 = vector.shape_cast %3 : vector<2x256xf32> to vector<2x1x256xf32>
    %cst_2 = arith.constant 3.125000e-02 : f32
    %5 = vector.broadcast %cst_2 : f32 to vector<2x1x256xf32>
    %6 = arith.mulf %4, %5 : vector<2x1x256xf32>
    %7 = vector.broadcast %6 : vector<2x1x256xf32> to vector<2x32x256xf32>
    %8 = arith.subf %2, %7 : vector<2x32x256xf32>
    %9 = arith.mulf %8, %8 : vector<2x32x256xf32>
    %cst_3 = arith.constant dense<0.000000e+00> : vector<2x256xf32>
    %10 = vector.multi_reduction <add>, %9, %cst_3 [1] : vector<2x32x256xf32> to vector<2x256xf32>
    %11 = vector.shape_cast %10 : vector<2x256xf32> to vector<2x1x256xf32>
    %cst_4 = arith.constant 3.125000e-02 : f32
    %12 = vector.broadcast %cst_4 : f32 to vector<2x1x256xf32>
    %13 = arith.mulf %11, %12 : vector<2x1x256xf32>
    %14 = math.sqrt %13 : vector<2x1x256xf32>
    %cst_5 = arith.constant 9.99999974E-6 : f32
    %15 = vector.broadcast %cst_5 : f32 to vector<2x1x256xf32>
    %16 = arith.addf %14, %15 : vector<2x1x256xf32>
    %17 = tpu.reciprocal %16 : vector<2x1x256xf32> -> vector<2x1x256xf32>
    %18 = vector.broadcast %17 : vector<2x1x256xf32> to vector<2x32x256xf32>
    %19 = arith.mulf %8, %18 : vector<2x32x256xf32>
    %20 = vector.shape_cast %19 : vector<2x32x256xf32> to vector<64x256xf32>
    %c0_6 = arith.constant 0 : index
    %c0_7 = arith.constant 0 : index
    %21 = vector.load %arg3[%c0_6, %c0_7] : memref<64x64xf32, #tpu.memory_space<vmem>>, vector<64x64xf32>
    %cst_8 = arith.constant dense<0.000000e+00> : vector<64x256xf32>
    %22 = tpu.matmul %21, %20, %cst_8 {dimension_numbers = #tpu.dot_dimension_numbers<[1], [0], [0], [1], [0, 0, 1, 1], [], []>} : vector<64x64xf32>, vector<64x256xf32>, vector<64x256xf32> -> vector<64x256xf32>
    %c0_9 = arith.constant 0 : index
    %c0_10 = arith.constant 0 : index
    %23 = vector.load %arg4[%c0_9, %c0_10] : memref<64x1xf32, #tpu.memory_space<vmem>>, vector<64x1xf32>
    %24 = vector.broadcast %23 : vector<64x1xf32> to vector<64x256xf32>
    %25 = arith.addf %22, %24 : vector<64x256xf32>
    %c0_11 = arith.constant 0 : index
    %c0_12 = arith.constant 0 : index
    %c0_13 = arith.constant 0 : index
    %26 = vector.load %arg5[%c0_11, %c0_12, %c0_13] : memref<1x64x256xf32, #tpu.memory_space<vmem>>, vector<1x64x256xf32>
    %27 = vector.shape_cast %26 : vector<1x64x256xf32> to vector<64x256xf32>
    %28 = vector.shape_cast %25 : vector<64x256xf32> to vector<1x64x256xf32>
    tpu.vector_store %arg5[%c0_11, %c0_12, %c0_13], %28 {strides = array<i32>} : memref<1x64x256xf32, #tpu.memory_space<vmem>>, vector<1x64x256xf32>,
    return
  }
  func.func @transform_0(%arg0: i32, %arg1: i32) -> (i32, i32, i32) {
    %c0_i32 = arith.constant 0 : i32
    %c0_i32_0 = arith.constant 0 : i32
    return %arg0, %c0_i32, %arg1 : i32, i32, i32
  }
  func.func @transform_1(%arg0: i32, %arg1: i32) -> (i32, i32) {
    %c0_i32 = arith.constant 0 : i32
    %c0_i32_0 = arith.constant 0 : i32
    %c0_i32_1 = arith.constant 0 : i32
    return %c0_i32, %c0_i32_0 : i32, i32
  }
  func.func @transform_2(%arg0: i32, %arg1: i32) -> (i32, i32) {
    %c0_i32 = arith.constant 0 : i32
    %c0_i32_0 = arith.constant 0 : i32
    %c0_i32_1 = arith.constant 0 : i32
    return %c0_i32, %c0_i32_0 : i32, i32
  }
  func.func @transform_3(%arg0: i32, %arg1: i32) -> (i32, i32, i32) {
    %c0_i32 = arith.constant 0 : i32
    %c0_i32_0 = arith.constant 0 : i32
    return %arg0, %c0_i32, %arg1 : i32, i32, i32
  }
}

module attributes {stable_mosaic.version = 11 : i64} {
  func.func @_prenorm_kernel(%arg0: i32, %arg1: i32, %arg2: memref<1x64x256xf32, #tpu.memory_space<vmem>>, %arg3: memref<64x64xf32, #tpu.memory_space<vmem>>, %arg4: memref<64x1xf32, #tpu.memory_space<vmem>>, %arg5: memref<1x64x256xf32, #tpu.memory_space<vmem>>) attributes {dimension_semantics = [#tpu.dimension_semantics<parallel>, #tpu.dimension_semantics<parallel>], iteration_bounds = array<i64: 2, 2>, scalar_prefetch = 0 : i64, scratch_operands = 0 : i64, tpu.core_type = #tpu.core_type<tc>, window_params = [{transform_indices = @transform_0, window_bounds = array<i64: 1, 64, 256>}, {pipeline_mode = #tpu.pipeline_mode<synchronous>, transform_indices = @transform_1, window_bounds = array<i64: 64, 64>}, {pipeline_mode = #tpu.pipeline_mode<synchronous>, transform_indices = @transform_2, window_bounds = array<i64: 64, 1>}, {transform_indices = @transform_3, window_bounds = array<i64: 1, 64, 256>}]} {
    %c0 = arith.constant 0 : index
    %c0_0 = arith.constant 0 : index
    %c0_1 = arith.constant 0 : index
    %0 = vector.load %arg2[%c0, %c0_0, %c0_1] : memref<1x64x256xf32, #tpu.memory_space<vmem>>, vector<1x64x256xf32>
    %1 = vector.shape_cast %0 : vector<1x64x256xf32> to vector<64x256xf32>
    %2 = vector.shape_cast %1 : vector<64x256xf32> to vector<2x32x256xf32>
    %cst = arith.constant dense<0.000000e+00> : vector<2x256xf32>
    %3 = vector.multi_reduction <add>, %2, %cst [1] : vector<2x32x256xf32> to vector<2x256xf32>
    %4 = vector.shape_cast %3 : vector<2x256xf32> to vector<2x1x256xf32>
    %cst_2 = arith.constant 3.125000e-02 : f32
    %5 = vector.broadcast %cst_2 : f32 to vector<2x1x256xf32>
    %6 = arith.mulf %4, %5 : vector<2x1x256xf32>
    %7 = vector.broadcast %6 : vector<2x1x256xf32> to vector<2x32x256xf32>
    %8 = arith.subf %2, %7 : vector<2x32x256xf32>
    %9 = arith.mulf %8, %8 : vector<2x32x256xf32>
    %cst_3 = arith.constant dense<0.000000e+00> : vector<2x256xf32>
    %10 = vector.multi_reduction <add>, %9, %cst_3 [1] : vector<2x32x256xf32> to vector<2x256xf32>
    %11 = vector.shape_cast %10 : vector<2x256xf32> to vector<2x1x256xf32>
    %cst_4 = arith.constant 3.125000e-02 : f32
    %12 = vector.broadcast %cst_4 : f32 to vector<2x1x256xf32>
    %13 = arith.mulf %11, %12 : vector<2x1x256xf32>
    %14 = math.sqrt %13 : vector<2x1x256xf32>
    %cst_5 = arith.constant 9.99999974E-6 : f32
    %15 = vector.broadcast %cst_5 : f32 to vector<2x1x256xf32>
    %16 = arith.addf %14, %15 : vector<2x1x256xf32>
    %17 = tpu.reciprocal %16 : vector<2x1x256xf32> -> vector<2x1x256xf32>
    %18 = vector.broadcast %17 : vector<2x1x256xf32> to vector<2x32x256xf32>
    %19 = arith.mulf %8, %18 : vector<2x32x256xf32>
    %20 = vector.shape_cast %19 : vector<2x32x256xf32> to vector<64x256xf32>
    %c0_6 = arith.constant 0 : index
    %c0_7 = arith.constant 0 : index
    %21 = vector.load %arg3[%c0_6, %c0_7] : memref<64x64xf32, #tpu.memory_space<vmem>>, vector<64x64xf32>
    %cst_8 = arith.constant dense<0.000000e+00> : vector<64x256xf32>
    %22 = tpu.matmul %21, %20, %cst_8 {dimension_numbers = #tpu.dot_dimension_numbers<[1], [0], [0], [1], [0, 0, 1, 1], [], []>} : vector<64x64xf32>, vector<64x256xf32>, vector<64x256xf32> -> vector<64x256xf32>
    %c0_9 = arith.constant 0 : index
    %c0_10 = arith.constant 0 : index
    %23 = vector.load %arg4[%c0_9, %c0_10] : memref<64x1xf32, #tpu.memory_space<vmem>>, vector<64x1xf32>
    %24 = vector.broadcast %23 : vector<64x1xf32> to vector<64x256xf32>
    %25 = arith.addf %22, %24 : vector<64x256xf32>
    %c0_11 = arith.constant 0 : index
    %c0_12 = arith.constant 0 : index
    %c0_13 = arith.constant 0 : index
    %26 = vector.load %arg5[%c0_11, %c0_12, %c0_13] : memref<1x64x256xf32, #tpu.memory_space<vmem>>, vector<1x64x256xf32>
    %27 = vector.shape_cast %26 : vector<1x64x256xf32> to vector<64x256xf32>
    %28 = vector.shape_cast %25 : vector<64x256xf32> to vector<1x64x256xf32>
    tpu.vector_store %arg5[%c0_11, %c0_12, %c0_13], %28 {strides = array<i32>} : memref<1x64x256xf32, #tpu.memory_space<vmem>>, vector<1x64x256xf32>,
    return
  }
  func.func @transform_0(%arg0: i32, %arg1: i32) -> (i32, i32, i32) {
    %c0_i32 = arith.constant 0 : i32
    %c0_i32_0 = arith.constant 0 : i32
    return %arg0, %c0_i32, %arg1 : i32, i32, i32
  }
  func.func @transform_1(%arg0: i32, %arg1: i32) -> (i32, i32) {
    %c0_i32 = arith.constant 0 : i32
    %c0_i32_0 = arith.constant 0 : i32
    %c0_i32_1 = arith.constant 0 : i32
    return %c0_i32, %c0_i32_0 : i32, i32
  }
  func.func @transform_2(%arg0: i32, %arg1: i32) -> (i32, i32) {
    %c0_i32 = arith.constant 0 : i32
    %c0_i32_0 = arith.constant 0 : i32
    %c0_i32_1 = arith.constant 0 : i32
    return %c0_i32, %c0_i32_0 : i32, i32
  }
  func.func @transform_3(%arg0: i32, %arg1: i32) -> (i32, i32, i32) {
    %c0_i32 = arith.constant 0 : i32
    %c0_i32_0 = arith.constant 0 : i32
    return %arg0, %c0_i32, %arg1 : i32, i32, i32
  }
}

</mosaic_0001>

<bundles_post_ra>
// kernel: tpu_custom_call.1
= control target key start
LH: loop header
LB: loop body
LE: loop exit
PB: predicated region body
PF: predicated region fallthrough
CT: control target
= control target key end

     0   :  { %8 = vsyncpa [#allocation3], 0  ;;  %s1508_s0 = inlined_call_operand.hbm [shape: f32[2,64,300], index: 0, kind: input, shape index: {}]   ;;  %s1509_s1 = inlined_call_operand.vmem [shape: f32[64,64], index: 1, kind: input, shape index: {}]   ;;  %s1510_s2 = inlined_call_operand.vmem [shape: f32[64,1], index: 2, kind: input, shape index: {}]   ;;  %s1511_s3 = inlined_call_operand.hbm [shape: f32[2,64,300], index: 3, kind: output, shape index: {}]  }
   0x1   :  { %10 = vsyncpa [#allocation3 + $0x1], 0 }
   0x2   :  { %11 = vsyncpa [#allocation4], 0 }
   0x3   :  { %13 = vsyncpa [#allocation4 + $0x1], 0  ;;  %s1041_s12 = smov 0   ;;  %s1043_s13 = smov 0  }
   0x4   :  { %s1045_s14 = smov 0   ;;  %s1047_s15 = smov 0  }
   0x5   :  { %s1049_s16 = smov 0   ;;  %s1051_s17 = smov 0  }
   0x6   :  { %s1053_s18 = smov 0   ;;  %s1055_s19 = smov 0  }
   0x7 LB: > { %s727_s20 = sadd.s32 4294967295, %s1011_s19   ;;  %s728_s21 = sadd.s32 4294967294, %s1011_s19   ;;  %s1011_s19 = sphi %s1055_s19, %s19_s19   ;;  %s1007_s18 = sphi %s1053_s18, %s1529_s18   ;;  %s1003_s17 = sphi %s1051_s17, %s1528_s17   ;;  %s999_s16 = sphi %s1049_s16, %s1527_s16   ;;  %s995_s15 = sphi %s1047_s15, %s1526_s15   ;;  %s991_s14 = sphi %s1045_s14, %s1525_s14   ;;  %s987_s13 = sphi %s1043_s13, %s1524_s13   ;;  %s983_s12 = sphi %s1041_s12, %s1523_s12  }
   0x8   : > { %s28_s22 = sadd.s32 1, %s1003_s17  ;;  %s31_s23 = sadd.s32 1, %s1007_s18 }
   0x9   : > { %p29_p0 = scmp.ge.s32.totalorder %s28_s22, 2  ;;  %p47_p1 = scmp.ne.s32.totalorder %s991_s14, %s987_s13 }
   0xa   : > { %p48_p2 = scmp.eq.s32.totalorder %s1011_s19, 0  ;;  %p53_p5 = scmp.ne.s32.totalorder %s987_s13, %s983_s12 }
   0xb   : > { %s1531_s22 = smov (%p29_p0, %s28_s22), 0  ;;  %s1533_s23 = smov (!%p29_p0, %s31_s23), %s1007_s18 }
   0xc   : > { %1514 = sst [smem:[#allocation8_spill]] %s1531_s22  ;;  %s36_s24 = ssub.s32 %s1003_s17, %s1531_s22 }
   0xd   : > { %p1093_p3 = por %p48_p2, %p47_p1  ;;  %p33_p4 = scmp.ge.s32.totalorder %s1533_s23, 2 }
   0xe   : > { %p54_p6 = scmp.eq.s32.totalorder %s727_s20, 0  ;;  %p121_p7 = scmp.eq.s32.totalorder %s727_s20, 3 }
   0xf   : > { %s1535_s23 = smov (%p33_p4, %s1533_s23), 0  ;;  %p127_p10 = scmp.eq.s32.totalorder %s728_s21, 3 }
  0x10   : > { %1516 = sst [smem:[#allocation9_spill]] %s1535_s23  ;;  %p1101_p8 = por %p54_p6, %p53_p5 }
  0x11   : > { %p1105_p9 = por %p121_p7, %p47_p1  ;;  %s35_s28 = ssub.s32 %s1007_s18, %s1535_s23 }
  0x12   : > { %s37_s29 = sor.u32 %s36_s24, %s35_s28  ;;  %s40_s30 = sadd.s32 1, %s991_s14 }
  0x13   : > { %p38_p11 = scmp.eq.s32.totalorder %s37_s29, 0  ;;  %p1112_p12 = por %p127_p10, %p53_p5 }
  0x14   : > { %p730_p13 = scmp.ge.s32.totalorder %s1011_s19, 4 }
  0x15   : > { %s1519_s4 = scalar_select %p1112_p12, 1, 0 }
  0x16   : > { %s1117_s5 = scalar_select %p38_p11, %s991_s14, %s40_s30  }
  0x17   : > { %149 = sbr.rel (%p730_p13) target bundleno = 67 (0x43), region = 24 }
  0x1e   : > { %152 = sbr.rel (!%p1093_p3) target bundleno = 67 (0x43), region = 28  ;;  %s153_s6 = sand.u32 (%p1093_p3), 1, %s991_s14  }
  0x1f   : > { %s732_s7 = sshll.u32 (%p1093_p3), %s1003_s17, 1  ;;  %s731_s8 = sshll.u32 (%p1093_p3), %s153_s6, 7 }
  0x20   : > { %s159_s9 = ssub.s32 (%p1093_p3), 3, %s732_s7  ;;  %s1130_s20 = scalar_lea.sflag (%p1093_p3), [#allocation3], %s153_s6 }
  0x21   : > { %p160_p0 = scmp.lt.s32.totalorder (%p1093_p3), %s159_s9, 2  ;;  %s157_s21 = scalar_lea.vmem (%p1093_p3), [#allocation2], %s731_s8 }
  0x25   : > { %s1537_s9 = smov (!%p160_p0, %s159_s9), 2 }
  0x26   : > { %s1127_s10 = sshll.u32 %s1537_s9, 10 }
  0x27   : > { %s164_s11 = ssub.s32 2048, %s1127_s10 }
  0x28   : > { %165 = vsyncadd %s1130_s20, %s164_s11  ;;  %p734_p1 = scmp.ne.s32.totalorder %s1127_s10, 0  ;;  %s788_s24 = smul.u32 24, %s1007_s18 }
  0x29   : > { %s736_s25 = sshll.u32 %s1537_s9, 3  ;;  %s173_s28 = sshll.u32 %s157_s21, 4  ;;  %s1136_s28 = int_to_ptr.vmem [resolvable:$true] %s173_s28 }
  0x2a   : > { %s168_s29 = sadd.s32 %s788_s24, %s732_s7  ;;  %s889_s7 = scalar_lea.hbm %s1508_s0, 6144 }
  0x2b   : > { %s735_s30 = sshll.u32 %s168_s29, 7 }
  0x2c   : > { %s1141_s6 = scalar_lea.hbm %s1508_s0, %s735_s30 }
  0x2d   : > { %s885_s8 = scalar_lea.hbm %s1141_s6, %s1127_s10  ;;  %p890_p5 = scmp.lt.u32.totalorder %s1141_s6, %s1508_s0 }
  0x2e   : > { %p886_p2 = scmp.ne.s32.totalorder %s1141_s6, %s885_s8  ;;  %p891_p6 = scmp.lt.u32.totalorder %s889_s7, %s885_s8 }
  0x2f   : > { %p893_p10 = scmp.lt.u32.totalorder %s885_s8, %s1141_s6 }
  0x30   : > { %p887_p3 = pnand %p886_p2, %p734_p1  ;;  %p892_p7 = por %p891_p6, %p890_p5 }
  0x32   : > { %p888_p4 = pneg %p887_p3  ;;  %p894_p11 = por %p893_p10, %p892_p7 }
  0x34   : > { %p895_p13 = pnand %p894_p11, %p888_p4 }
  0x36   : > { %898 = shalt.err (!%p895_p13)
}
  0x37   : > { %s899_s22 = scalar_lea.vmem %s1136_s28, %s1127_s10  ;;  %s1013_s23 = smov [#allocation2]  }
  0x38   : > { %p900_p0 = scmp.ne.s32.totalorder %s1136_s28, %s899_s22  ;;  %s903_s30 = sshll.u32 %s1013_s23, 4  ;;  %s904_s30 = int_to_ptr.vmem [resolvable:$false] %s903_s30 }
  0x39   : > { %s905_s11 = scalar_lea.vmem %s904_s30, 4096  ;;  %p906_p12 = scmp.lt.s32.totalorder %s1136_s28, %s904_s30 }
  0x3a   : > { %p901_p2 = pnand %p900_p0, %p734_p1  ;;  %p907_p5 = scmp.lt.s32.totalorder %s905_s11, %s899_s22 }
  0x3c   : > { %p902_p3 = pneg %p901_p2  ;;  %p908_p6 = por %p907_p5, %p906_p12 }
  0x3e   : > { %p909_p7 = pnand %p908_p6, %p902_p3 }
  0x40   : > { %912 = shalt.err (!%p909_p7)
}
  0x41   : > { %s1014_s8 = smov 384   ;;  %s1015_s21 = smov 256  }
  0x42   : > { %179 = dma.hbm_to_vmem [thread:$0]  (%p734_p1), %s1141_s6, %s1127_s10, %s1136_s28, %s1130_s20, %s1014_s8, %s1015_s21, %s736_s25  }
  0x43 PF: > { %p739_p4 = scmp.ge.s32.totalorder %s1011_s19, 1  ;;  %p181_p10 = scmp.lt.s32.totalorder %s1011_s19, 5 }
  0x45   : > { %p182_p12 = pnand %p739_p4, %p181_p10 }
  0x46   : > { %s1173_s7 = sand.u32 (!%p182_p12), 1, %s987_s13  }
  0x47   : > { %185 = sbr.rel (%p182_p12) target bundleno = 430 (0x1ae), region = 32  ;;  %s740_s24 = sshll.u32 (!%p182_p12), %s1173_s7, 7 }
  0x48   : > { %s188_s29 = scalar_lea.sflag (!%p182_p12), [#allocation3], %s1173_s7  ;;  %s1179_s9 = scalar_lea.vmem (!%p182_p12), [#allocation2], %s740_s24 }
  0x4e   : > { %974 = dma.done.wait (%p1101_p8), %s188_s29, 2048  }
  0x4f   : > { %976 = vsyncadd (%p1101_p8), %s188_s29, 4294965248  ;;  %v1016_v0 = vmov 0.0   ;;  %v1017_v1 = vmov 0   ;;  %v1188_v2 = vld [vmem:[%s1179_s9 + $0x8] sm:$0xff]  ;;  %v1191_v3 = vld [vmem:[%s1179_s9 + $0x18] sm:$0xff]  ;;  %vm460_vm8 = vcmask 523264  }
  0x50   : > { %549 = vmatprep.mubr.f32.mxu0 %v1016_v0  ;;  %573 = vmatprep.mubr.f32.mxu1 %v1016_v0  ;;  %v1194_v4 = vld [vmem:[%s1179_s9 + $0x28] sm:$0xff]  ;;  %v249_v5 = vadd.f32 %v1191_v3, %v1188_v2  ;;  %v1199_v6 = vld [vmem:[%s1179_s9] sm:$0xff]  ;;  %v1202_v7 = vld [vmem:[%s1179_s9 + $0x10] sm:$0xff]  ;;  %s1411_s28 = scalar_lea.vmem [#allocation5], %s740_s24  ;;  %s615_s24 = scalar_lea.sflag [#allocation4], %s1173_s7 }
  0x51   : > { %868 = vset.pattern.permute.xlu1 %v1017_v1  ;;  %867 = vset.pattern.permute.xlu0 %v1017_v1  ;;  %v1205_v8 = vld [vmem:[%s1179_s9 + $0x38] sm:$0xff]  ;;  %v1208_v9 = vld [vmem:[%s1179_s9 + $0x20] sm:$0xff]  ;;  %v240_v10 = vadd.f32 %v1202_v7, %v1199_v6  ;;  %v1213_v11 = vld [vmem:[%s1179_s9 + $0x48] sm:$0xff]  ;;  %s751_s6 = sshll.u32 (%p1105_p9), %s995_s15, 1 }
  0x52   : > { %v250_v12 = vadd.f32 %v249_v5, %v1194_v4  ;;  %v1217_v13 = vld [vmem:[%s1179_s9 + $0x30] sm:$0xff]  ;;  %v1220_v14 = vld [vmem:[%s1179_s9 + $0x58] sm:$0xff]  ;;  %v1223_v15 = vld [vmem:[%s1179_s9 + $0x68] sm:$0xff]  ;;  %s623_s22 = ssub.s32 (%p1105_p9), 3, %s751_s6 }
  0x53   : > { %v241_v16 = vadd.f32 %v240_v10, %v1208_v9  ;;  %v267_v17 = vadd.f32 %v1220_v14, %v1213_v11  ;;  %v1229_v18 = vld [vmem:[%s1179_s9 + $0x40] sm:$0xff]  ;;  %v1232_v19 = vld [vmem:[%s1179_s9 + $0x50] sm:$0xff]  ;;  %v1239_v22 = vld [vmem:[%s1179_s9 + $0x78] sm:$0xff]  ;;  %p624_p8 = scmp.lt.s32.totalorder (%p1105_p9), %s623_s22, 2 }
  0x54   : > { %v1235_v20 = vld [vmem:[%s1179_s9 + $0x60] sm:$0xff]  ;;  %v251_v21 = vadd.f32 %v250_v12, %v1205_v8  ;;  %v258_v23 = vadd.f32 %v1232_v19, %v1229_v18  ;;  %v1246_v26 = vld [vmem:[%s1179_s9 + $0x70] sm:$0xff]  ;;  %v415_v37 = vld [vmem:[%s1510_s2 + $0x18] sm:$0xff] }
  0x55   : > { %v242_v24 = vadd.f32 %v241_v16, %v1217_v13  ;;  %v268_v25 = vadd.f32 %v267_v17, %v1223_v15  ;;  %v414_v31 = vld [vmem:[%s1510_s2 + $0x10] sm:$0xff]  ;;  %v412_v32 = vld [vmem:[%s1510_s2] sm:$0xff]  ;;  %v413_v38 = vld [vmem:[%s1510_s2 + $0x8] sm:$0xff] }
  0x56   : > { %v252_v27 = vrot.slane %v251_v21, 4  ;;  %v259_v28 = vadd.f32 %v258_v23, %v1235_v20  ;;  %432 = vperm.xlu1 %868, %v414_v31   ;;  %422 = vperm.xlu0 %867, %v412_v32   ;;  %v417_v47 = vld [vmem:[%s1510_s2 + $0x28] sm:$0xff]  ;;  %v416_v48 = vld [vmem:[%s1510_s2 + $0x20] sm:$0xff]  ;;  %v419_v57 = vld [vmem:[%s1510_s2 + $0x38] sm:$0xff] }
  0x57   : > { %v243_v29 = vrot.slane %v242_v24, 4  ;;  %v269_v30 = vadd.f32 %v268_v25, %v1239_v22  ;;  %v418_v59 = vld [vmem:[%s1510_s2 + $0x30] sm:$0xff] }
  0x58   : > { %v253_v33 = vadd.f32 %v252_v27, %v251_v21  ;;  %v260_v34 = vadd.f32 %v259_v28, %v1246_v26 }
  0x59   : > { %v244_v35 = vadd.f32 %v243_v29, %v242_v24  ;;  %v270_v36 = vrot.slane %v269_v30, 4 }
  0x5a   : > { %v254_v39 = vrot.slane %v253_v33, 2  ;;  %v261_v40 = vrot.slane %v260_v34, 4  ;;  %437 = vperm.xlu1 %868, %v415_v37   ;;  %427 = vperm.xlu0 %867, %v413_v38  }
  0x5b   : > { %v245_v41 = vrot.slane %v244_v35, 2  ;;  %v271_v42 = vadd.f32 %v270_v36, %v269_v30 }
  0x5c   : > { %v255_v43 = vadd.f32 %v254_v39, %v253_v33  ;;  %v262_v44 = vadd.f32 %v261_v40, %v260_v34 }
  0x5d   : > { %v246_v45 = vadd.f32 %v245_v41, %v244_v35  ;;  %v272_v46 = vrot.slane %v271_v42, 2 }
  0x5e   : > { %v256_v49 = vrot.slane %v255_v43, 1  ;;  %v263_v50 = vrot.slane %v262_v44, 2  ;;  %447 = vperm.xlu1 %868, %v417_v47   ;;  %442 = vperm.xlu0 %867, %v416_v48  }
  0x5f   : > { %v247_v51 = vrot.slane %v246_v45, 1  ;;  %v273_v52 = vadd.f32 %v272_v46, %v271_v42 }
  0x60   : > { %v257_v53 = vadd.f32 %v256_v49, %v255_v43  ;;  %v264_v54 = vadd.f32 %v263_v50, %v262_v44 }
  0x61   : > { %v248_v55 = vadd.f32 %v247_v51, %v246_v45  ;;  %v274_v56 = vrot.slane %v273_v52, 1 }
  0x62   : > { %v277_v58 = vmul.f32 0.03125, %v257_v53  ;;  %v265_v62 = vrot.slane %v264_v54, 1  ;;  %457 = vperm.xlu1 %868, %v419_v57   ;;  %452 = vperm.xlu0 %867, %v418_v59  }
  0x63   : > { %v276_v60 = vmul.f32 0.03125, %v248_v55  ;;  %v275_v61 = vadd.f32 %v274_v56, %v273_v52 }
  0x64   : > { %v1276_v63 = vsub.f32 %v1188_v2, %v277_v58  ;;  %v1279_v1 = vsub.f32 %v1191_v3, %v277_v58  ;;  %v1282_v5 = vsub.f32 %v1194_v4, %v277_v58  ;;  %v1285_v10 = vsub.f32 %v1205_v8, %v277_v58 }
  0x65   : > { %v1288_v12 = vsub.f32 %v1199_v6, %v276_v60  ;;  %v1291_v16 = vsub.f32 %v1202_v7, %v276_v60  ;;  %v1294_v17 = vsub.f32 %v1208_v9, %v276_v60  ;;  %v1297_v2 = vsub.f32 %v1217_v13, %v276_v60 }
  0x66   : > { %v297_v3 = vmul.f32 %v1276_v63, %v1276_v63  ;;  %v299_v4 = vmul.f32 %v1279_v1, %v1279_v1  ;;  %v301_v6 = vmul.f32 %v1282_v5, %v1282_v5  ;;  %v303_v13 = vmul.f32 %v1285_v10, %v1285_v10 }
  0x67   : > { %v296_v7 = vmul.f32 %v1288_v12, %v1288_v12  ;;  %v298_v8 = vmul.f32 %v1291_v16, %v1291_v16  ;;  %v300_v9 = vmul.f32 %v1294_v17, %v1294_v17  ;;  %v279_v23 = vmul.f32 0.03125, %v275_v61 }
  0x68   : > { %v321_v21 = vadd.f32 %v299_v4, %v297_v3  ;;  %v266_v24 = vadd.f32 %v265_v62, %v264_v54  ;;  %v302_v25 = vmul.f32 %v1297_v2, %v1297_v2 }
  0x69   : > { %v312_v27 = vadd.f32 %v298_v8, %v296_v7  ;;  %v1316_v29 = vsub.f32 %v1213_v11, %v279_v23  ;;  %v1319_v30 = vsub.f32 %v1220_v14, %v279_v23  ;;  %v1322_v31 = vsub.f32 %v1223_v15, %v279_v23 }
  0x6a   : > { %v322_v28 = vadd.f32 %v321_v21, %v301_v6  ;;  %v1325_v33 = vsub.f32 %v1239_v22, %v279_v23  ;;  %v278_v34 = vmul.f32 0.03125, %v266_v24 }
  0x6b   : > { %v313_v32 = vadd.f32 %v312_v27, %v300_v9  ;;  %v305_v36 = vmul.f32 %v1316_v29, %v1316_v29  ;;  %v307_v37 = vmul.f32 %v1319_v30, %v1319_v30  ;;  %v309_v11 = vmul.f32 %v1322_v31, %v1322_v31 }
  0x6c   : > { %v323_v35 = vadd.f32 %v322_v28, %v303_v13  ;;  %v311_v15 = vmul.f32 %v1325_v33, %v1325_v33  ;;  %v1336_v38 = vsub.f32 %v1229_v18, %v278_v34  ;;  %v1339_v22 = vsub.f32 %v1232_v19, %v278_v34 }
  0x6d   : > { %v314_v14 = vadd.f32 %v313_v32, %v302_v25  ;;  %v339_v40 = vadd.f32 %v307_v37, %v305_v36  ;;  %v1342_v41 = vsub.f32 %v1235_v20, %v278_v34  ;;  %v1345_v42 = vsub.f32 %v1246_v26, %v278_v34 }
  0x6e   : > { %v324_v39 = vrot.slane %v323_v35, 4  ;;  %v304_v44 = vmul.f32 %v1336_v38, %v1336_v38  ;;  %v306_v45 = vmul.f32 %v1339_v22, %v1339_v22 }
  0x6f   : > { %v315_v43 = vrot.slane %v314_v14, 4  ;;  %v340_v46 = vadd.f32 %v339_v40, %v309_v11  ;;  %v308_v19 = vmul.f32 %v1342_v41, %v1342_v41  ;;  %v310_v20 = vmul.f32 %v1345_v42, %v1345_v42 }
  0x70   : > { %v325_v18 = vadd.f32 %v324_v39, %v323_v35  ;;  %v330_v48 = vadd.f32 %v306_v45, %v304_v44 }
  0x71   : > { %v316_v47 = vadd.f32 %v315_v43, %v314_v14  ;;  %v341_v26 = vadd.f32 %v340_v46, %v311_v15 }
  0x72   : > { %v326_v49 = vrot.slane %v325_v18, 2  ;;  %v331_v51 = vadd.f32 %v330_v48, %v308_v19 }
  0x73   : > { %v317_v50 = vrot.slane %v316_v47, 2  ;;  %v342_v53 = vrot.slane %v341_v26, 4 }
  0x74   : > { %v327_v52 = vadd.f32 %v326_v49, %v325_v18  ;;  %v332_v55 = vadd.f32 %v331_v51, %v310_v20 }
  0x75   : > { %v318_v54 = vadd.f32 %v317_v50, %v316_v47  ;;  %v343_v57 = vadd.f32 %v342_v53, %v341_v26 }
  0x76   : > { %v328_v56 = vrot.slane %v327_v52, 1  ;;  %v333_v59 = vrot.slane %v332_v55, 4 }
  0x77   : > { %v319_v58 = vrot.slane %v318_v54, 1  ;;  %v344_v61 = vrot.slane %v343_v57, 2 }
  0x78   : > { %v329_v60 = vadd.f32 %v328_v56, %v327_v52  ;;  %v334_v3 = vadd.f32 %v333_v59, %v332_v55 }
  0x79   : > { %v320_v62 = vadd.f32 %v319_v58, %v318_v54  ;;  %v345_v6 = vadd.f32 %v344_v61, %v343_v57 }
  0x7a   : > { %v349_v4 = vmul.f32 0.03125, %v329_v60  ;;  %v335_v8 = vrot.slane %v334_v3, 2 }
  0x7b   : > { %v348_v7 = vmul.f32 0.03125, %v320_v62  ;;  %v346_v9 = vrot.slane %v345_v6, 1 }
  0x7c   : > { %869 = vrsqrt.f32 %v349_v4  ;;  %v336_v13 = vadd.f32 %v335_v8, %v334_v3  ;;  %vm361_vm0 = vcmp.eq.f32.partialorder %v349_v4, inf  ;;  %vm363_vm1 = vcmp.eq.f32.partialorder %v349_v4, 0.0 }
  0x7d   : > { %871 = vrsqrt.f32 %v348_v7  ;;  %v347_v21 = vadd.f32 %v346_v9, %v345_v6  ;;  %v364_v32 = vand.u32 2147483648, %v349_v4  ;;  %vm354_vm2 = vcmp.eq.f32.partialorder %v348_v7, inf }
  0x7e   : > { %v337_v23 = vrot.slane %v336_v13, 1  ;;  %v357_v36 = vand.u32 2147483648, %v348_v7  ;;  %vm356_vm3 = vcmp.eq.f32.partialorder %v348_v7, 0.0 }
  0x7f   : > { %v351_v24 = vmul.f32 0.03125, %v347_v21  ;;  %v407_v21 = vld [vmem:[%s1509_s1 + $0x18] sm:$0xff] }
  0x80   : > { %v338_v25 = vadd.f32 %v337_v23, %v336_v13  ;;  %v411_v23 = vld [vmem:[%s1509_s1 + $0x38] sm:$0xff] }
  0x81   : > { %873 = vrsqrt.f32 %v351_v24  ;;  %vm375_vm4 = vcmp.eq.f32.partialorder %v351_v24, inf  ;;  %v378_v45 = vand.u32 2147483648, %v351_v24  ;;  %vm377_vm5 = vcmp.eq.f32.partialorder %v351_v24, 0.0 }
  0x82   : > { %v350_v27 = vmul.f32 0.03125, %v338_v25 }
  0x84   : > { %875 = vrsqrt.f32 %v350_v27  ;;  %vm368_vm6 = vcmp.eq.f32.partialorder %v350_v27, inf  ;;  %v371_v47 = vand.u32 2147483648, %v350_v27  ;;  %vm370_vm7 = vcmp.eq.f32.partialorder %v350_v27, 0.0 }
  0x86   : > { %v870_v28 = vpop.eup %869 }
  0x87   : > { %v872_v34 = vpop.eup %871  ;;  %v360_v35 = vmul.f32 %v870_v28, %v349_v4 }
  0x88   : > { %v353_v37 = vmul.f32 %v872_v34, %v348_v7 }
  0x89   : > { %v362_v11 = vsel %vm361_vm0, %v349_v4, %v360_v35 }
  0x8a   : > { %v365_v14 = vsel %vm363_vm1, %v364_v32, %v362_v11  ;;  %v355_v15 = vsel %vm354_vm2, %v348_v7, %v353_v37 }
  0x8b   : > { %v381_v39 = vadd.f32 1e-05, %v365_v14  ;;  %v358_v40 = vsel %vm356_vm3, %v357_v36, %v355_v15  ;;  %v874_v44 = vpop.eup %873 }
  0x8c   : > { %v380_v43 = vadd.f32 1e-05, %v358_v40  ;;  %v374_v18 = vmul.f32 %v874_v44, %v351_v24 }
  0x8d   : > { %877 = vrcp.f32 %v381_v39 }
  0x8e   : > { %879 = vrcp.f32 %v380_v43  ;;  %v876_v46 = vpop.eup %875  ;;  %v376_v19 = vsel %vm375_vm4, %v351_v24, %v374_v18 }
  0x8f   : > { %v379_v20 = vsel %vm377_vm5, %v378_v45, %v376_v19  ;;  %v367_v48 = vmul.f32 %v876_v46, %v350_v27 }
  0x90   : > { %v383_v49 = vadd.f32 1e-05, %v379_v20 }
  0x91   : > { %v369_v26 = vsel %vm368_vm6, %v350_v27, %v367_v48 }
  0x92   : > { %881 = vrcp.f32 %v383_v49  ;;  %v372_v50 = vsel %vm370_vm7, %v371_v47, %v369_v26 }
  0x93   : > { %v382_v51 = vadd.f32 1e-05, %v372_v50 }
  0x95   : > { %883 = vrcp.f32 %v382_v51 }
  0x97   : > { %v878_v52 = vpop.eup %877 }
  0x98   : > { %v880_v53 = vpop.eup %879  ;;  %v389_v54 = vmul.f32 %v878_v52, %v1276_v63  ;;  %v391_v55 = vmul.f32 %v878_v52, %v1279_v1  ;;  %v393_v56 = vmul.f32 %v878_v52, %v1282_v5  ;;  %v395_v57 = vmul.f32 %v878_v52, %v1285_v10 }
  0x99   : > { %v388_v58 = vmul.f32 %v880_v53, %v1288_v12  ;;  %v390_v59 = vmul.f32 %v880_v53, %v1291_v16  ;;  %v392_v60 = vmul.f32 %v880_v53, %v1294_v17  ;;  %v394_v61 = vmul.f32 %v880_v53, %v1297_v2 }
  0x9a   : > { %v764_v62 = vpack.c.bf16 %v391_v55, %v389_v54  ;;  %v768_v3 = vpack.c.bf16 %v395_v57, %v393_v56 }
  0x9b   : > { %v766_v4 = vpack.c.bf16 %v390_v59, %v388_v58  ;;  %v770_v63 = vpack.c.bf16 %v394_v61, %v392_v60 }
  0x9c   : > { %765 = vmatprep.subr.bf16.mxu0 %v764_v62  ;;  %780 = vmatprep.subr.bf16.mxu1 %v764_v62  ;;  %v882_v1 = vpop.eup %881 }
  0x9d   : > { %767 = vmatpush1.bf16.msra.mxu0 %v766_v4  ;;  %784 = vmatpush1.bf16.msra.mxu1 %v766_v4  ;;  %v397_v5 = vmul.f32 %v882_v1, %v1316_v29  ;;  %v399_v10 = vmul.f32 %v882_v1, %v1319_v30  ;;  %v401_v16 = vmul.f32 %v882_v1, %v1322_v31  ;;  %v404_v31 = vld [vmem:[%s1509_s1] sm:$0xff] }
  0x9e   : > { %769 = vmatprep.subr.bf16.mxu0 %v768_v3  ;;  %781 = vmatprep.subr.bf16.mxu1 %v768_v3  ;;  %v403_v17 = vmul.f32 %v882_v1, %v1325_v33  ;;  %v408_v33 = vld [vmem:[%s1509_s1 + $0x20] sm:$0xff] }
  0x9f   : > { %v772_v12 = vpack.c.bf16 %v399_v10, %v397_v5  ;;  %v884_v2 = vpop.eup %883 }
  0xa0   : > { %v396_v6 = vmul.f32 %v884_v2, %v1336_v38  ;;  %v398_v7 = vmul.f32 %v884_v2, %v1339_v22  ;;  %v400_v8 = vmul.f32 %v884_v2, %v1342_v41  ;;  %v402_v29 = vmul.f32 %v884_v2, %v1345_v42  ;;  %v405_v38 = vld [vmem:[%s1509_s1 + $0x8] sm:$0xff]  ;;  %v406_v41 = vld [vmem:[%s1509_s1 + $0x10] sm:$0xff] }
  0xa1   : > { %771 = vmatpush1.bf16.msra.mxu0 %v770_v63  ;;  %785 = vmatpush1.bf16.msra.mxu1 %v770_v63  ;;  %v776_v9 = vpack.c.bf16 %v403_v17, %v401_v16  ;;  %v409_v22 = vld [vmem:[%s1509_s1 + $0x28] sm:$0xff]  ;;  %v410_v42 = vld [vmem:[%s1509_s1 + $0x30] sm:$0xff] }
  0xa2   : > { %773 = vmatprep.subr.bf16.mxu0 %v772_v12  ;;  %782 = vmatprep.subr.bf16.mxu1 %v772_v12  ;;  %v774_v30 = vpack.c.bf16 %v398_v7, %v396_v6  ;;  %v778_v13 = vpack.c.bf16 %v402_v29, %v400_v8 }
  0xa5   : > { %775 = vmatpush1.bf16.msra.mxu0 %v774_v30  ;;  %786 = vmatpush1.bf16.msra.mxu1 %v774_v30 }
  0xa6   : > { %777 = vmatprep.subr.bf16.mxu0 %v776_v9  ;;  %783 = vmatprep.subr.bf16.mxu1 %v776_v9 }
  0xa9   : > { %779 = vmatpush1.bf16.msra.mxu0 %v778_v13  ;;  %787 = vmatpush1.bf16.msra.mxu1 %v778_v13 }
  0xac   : > { %742 = vmatmul.mubr.msk.f32.vlgmr.msra.gmra.mrb[0].mxu0 %vm460_vm8, %v404_v31  ;;  %746 = vmatmul.mubr.msk.f32.vlgmr.msra.gmra.mrb[0].mxu1 %vm460_vm8, %v408_v33 }
  0xad   : > { %555 = vmatprep.mubr.f32.mxu0 %v1016_v0  ;;  %579 = vmatprep.mubr.f32.mxu1 %v1016_v0 }
  0xb0   : > { %743 = vmatmul.mubr.msk.f32.gmra.mrb[2].mxu0 %vm460_vm8, %v405_v38  ;;  %747 = vmatmul.mubr.msk.f32.gmra.mrb[2].mxu1 %vm460_vm8, %v409_v22 }
  0xb1   : > { %561 = vmatprep.mubr.f32.mxu0 %v1016_v0  ;;  %585 = vmatprep.mubr.f32.mxu1 %v1016_v0 }
  0xb4   : > { %744 = vmatmul.mubr.msk.f32.gmra.mrb[4].mxu0 %vm460_vm8, %v406_v41  ;;  %748 = vmatmul.mubr.msk.f32.gmra.mrb[4].mxu1 %vm460_vm8, %v410_v42 }
  0xb5   : > { %567 = vmatprep.mubr.f32.mxu0 %v1016_v0  ;;  %591 = vmatprep.mubr.f32.mxu1 %v1016_v0 }
  0xb8   : > { %745 = vmatmul.mubr.msk.f32.gmra.mrb[6].mxu0 %vm460_vm8, %v407_v21  ;;  %749 = vmatmul.mubr.msk.f32.gmra.mrb[6].mxu1 %vm460_vm8, %v411_v23 }
  0xd5   : > { %v423_v24 = vpop.permute.xlu0 %422  ;;  %v433_v25 = vpop.permute.xlu1 %432 }
  0xd9   : > { %v428_v27 = vpop.permute.xlu0 %427  ;;  %v438_v28 = vpop.permute.xlu1 %437 }
  0xdd   : > { %v443_v32 = vpop.permute.xlu0 %442  ;;  %v448_v39 = vpop.permute.xlu1 %447 }
  0xe1   : > { %v453_v20 = vpop.permute.xlu0 %452  ;;  %v458_v55 = vpop.permute.xlu1 %457 }
 0x17f   : > { %v551_v34 = vpop.f32.mrb[0].mxu0  ;;  %v575_v0 = vpop.f32.mrb[0].mxu1 }
 0x180   : > { %v552_v35 = vadd.f32 %v551_v34, %v423_v24  ;;  %v576_v36 = vadd.f32 %v575_v0, %v443_v32  ;;  %v553_v37 = vpop.f32.mrb[1].mxu0  ;;  %v577_v11 = vpop.f32.mrb[1].mxu1 }
 0x181   : > { %v554_v14 = vadd.f32 %v553_v37, %v423_v24  ;;  %v578_v15 = vadd.f32 %v577_v11, %v443_v32 }
 0x182   : > { %598 = vst [vmem:[%s1411_s28] sm:$0xff] %v552_v35  ;;  %606 = vst [vmem:[%s1411_s28 + $0x40] sm:$0xff] %v576_v36 }
 0x183   : > { %599 = vst [vmem:[%s1411_s28 + $0x8] sm:$0xff] %v554_v14  ;;  %607 = vst [vmem:[%s1411_s28 + $0x48] sm:$0xff] %v578_v15  ;;  %v557_v40 = vpop.f32.mrb[2].mxu0  ;;  %v581_v43 = vpop.f32.mrb[2].mxu1 }
 0x184   : > { %v558_v44 = vadd.f32 %v557_v40, %v428_v27  ;;  %v582_v45 = vadd.f32 %v581_v43, %v448_v39  ;;  %v559_v18 = vpop.f32.mrb[3].mxu0  ;;  %v583_v46 = vpop.f32.mrb[3].mxu1 }
 0x185   : > { %v560_v19 = vadd.f32 %v559_v18, %v428_v27  ;;  %v584_v47 = vadd.f32 %v583_v46, %v448_v39 }
 0x186   : > { %600 = vst [vmem:[%s1411_s28 + $0x10] sm:$0xff] %v558_v44  ;;  %608 = vst [vmem:[%s1411_s28 + $0x50] sm:$0xff] %v582_v45 }
 0x187   : > { %601 = vst [vmem:[%s1411_s28 + $0x18] sm:$0xff] %v560_v19  ;;  %609 = vst [vmem:[%s1411_s28 + $0x58] sm:$0xff] %v584_v47  ;;  %v563_v48 = vpop.f32.mrb[4].mxu0  ;;  %v587_v49 = vpop.f32.mrb[4].mxu1 }
 0x188   : > { %v564_v26 = vadd.f32 %v563_v48, %v433_v25  ;;  %v588_v50 = vadd.f32 %v587_v49, %v453_v20  ;;  %v565_v51 = vpop.f32.mrb[5].mxu0  ;;  %v589_v52 = vpop.f32.mrb[5].mxu1 }
 0x189   : > { %v566_v53 = vadd.f32 %v565_v51, %v433_v25  ;;  %v590_v54 = vadd.f32 %v589_v52, %v453_v20  ;;  %621 = sbr.rel (!%p1105_p9) target bundleno = 430 (0x1ae), region = 40 }
 0x18a   : > { %602 = vst [vmem:[%s1411_s28 + $0x20] sm:$0xff] %v564_v26  ;;  %610 = vst [vmem:[%s1411_s28 + $0x60] sm:$0xff] %v588_v50 }
 0x18b   : > { %603 = vst [vmem:[%s1411_s28 + $0x28] sm:$0xff] %v566_v53  ;;  %611 = vst [vmem:[%s1411_s28 + $0x68] sm:$0xff] %v590_v54  ;;  %v569_v56 = vpop.f32.mrb[6].mxu0  ;;  %v593_v57 = vpop.f32.mrb[6].mxu1 }
 0x18c   : > { %v570_v58 = vadd.f32 %v569_v56, %v438_v28  ;;  %v594_v59 = vadd.f32 %v593_v57, %v458_v55  ;;  %v571_v60 = vpop.f32.mrb[7].mxu0  ;;  %v595_v61 = vpop.f32.mrb[7].mxu1 }
 0x18d   : > { %v572_v62 = vadd.f32 %v571_v60, %v438_v28  ;;  %v596_v3 = vadd.f32 %v595_v61, %v458_v55 }
 0x18e   : > { %604 = vst [vmem:[%s1411_s28 + $0x30] sm:$0xff] %v570_v58  ;;  %612 = vst [vmem:[%s1411_s28 + $0x70] sm:$0xff] %v594_v59 }
 0x18f   : > { %605 = vst [vmem:[%s1411_s28 + $0x38] sm:$0xff] %v572_v62  ;;  %613 = vst [vmem:[%s1411_s28 + $0x78] sm:$0xff] %v596_v3 }
 0x190   : > { %s1539_s22 = smov (!%p624_p8, %s623_s22), 2 }
 0x191   : > { %s1436_s23 = sshll.u32 %s1539_s22, 10 }
 0x192   : > { %s628_s30 = ssub.s32 2048, %s1436_s23 }
 0x193   : > { %629 = vsyncadd %s615_s24, %s628_s30  ;;  %p753_p9 = scmp.ne.s32.totalorder %s1436_s23, 0  ;;  %s789_s27 = smul.u32 24, %s999_s16 }
 0x194   : > { %s755_s15 = sshll.u32 %s1539_s22, 3  ;;  %s637_s11 = sshll.u32 %s1411_s28, 4  ;;  %s1445_s11 = int_to_ptr.vmem [resolvable:$true] %s637_s11 }
 0x195   : > { %s632_s8 = sadd.s32 %s789_s27, %s751_s6  ;;  %s913_s10 = scalar_lea.vmem %s1445_s11, %s1436_s23 }
 0x196   : > { %s754_s21 = sshll.u32 %s632_s8, 7  ;;  %p914_p1 = scmp.ne.s32.totalorder %s1445_s11, %s913_s10 }
 0x197   : > { %s1450_s26 = scalar_lea.hbm %s1511_s3, %s754_s21  ;;  %s1018_s16 = smov [#allocation5]  }
 0x198   : > { %p915_p11 = pnand %p914_p1, %p753_p9  ;;  %s917_s20 = sshll.u32 %s1018_s16, 4  ;;  %s918_s20 = int_to_ptr.vmem [resolvable:$false] %s917_s20 }
 0x199   : > { %s919_s25 = scalar_lea.vmem %s918_s20, 4096  ;;  %p920_p0 = scmp.lt.s32.totalorder %s1445_s11, %s918_s20 }
 0x19a   : > { %p916_p13 = pneg %p915_p11  ;;  %p921_p2 = scmp.lt.s32.totalorder %s919_s25, %s913_s10 }
 0x19c   : > { %p922_p3 = por %p921_p2, %p920_p0 }
 0x19e   : > { %p923_p5 = pnand %p922_p3, %p916_p13 }
 0x1a0   : > { %926 = shalt.err (!%p923_p5)
}
 0x1a1   : > { %s927_s28 = scalar_lea.hbm %s1450_s26, %s1436_s23  ;;  %s931_s27 = scalar_lea.hbm %s1511_s3, 6144 }
 0x1a2   : > { %p928_p6 = scmp.ne.s32.totalorder %s1450_s26, %s927_s28  ;;  %p932_p10 = scmp.lt.u32.totalorder %s1450_s26, %s1511_s3 }
 0x1a3   : > { %p933_p12 = scmp.lt.u32.totalorder %s931_s27, %s927_s28  ;;  %p935_p1 = scmp.lt.u32.totalorder %s927_s28, %s1450_s26 }
 0x1a4   : > { %p929_p7 = pnand %p928_p6, %p753_p9 }
 0x1a5   : > { %p934_p8 = por %p933_p12, %p932_p10 }
 0x1a6   : > { %p930_p4 = pneg %p929_p7 }
 0x1a7   : > { %p936_p11 = por %p935_p1, %p934_p8 }
 0x1a9   : > { %p937_p13 = pnand %p936_p11, %p930_p4 }
 0x1ab   : > { %940 = shalt.err (!%p937_p13)
}
 0x1ac   : > { %s1019_s29 = smov 256   ;;  %s1020_s9 = smov 384  }
 0x1ad   : > { %643 = dma.vmem_to_hbm [thread:$0]  (%p753_p9), %s1445_s11, %s1436_s23, %s1450_s26, %s615_s24, %s1019_s29, %s1020_s9, %s755_s15  }
 0x1ae PF: > { %p796_p0 = scmp.ge.s32.totalorder %s1011_s19, 2  ;;  %s652_s10 = sand.u32 1, %s983_s12  }
 0x1af   : > { %p1520_p2 = scmp.ne.s32.totalorder %s1519_s4, 0  ;;  %s653_s16 = scalar_lea.sflag [#allocation4], %s652_s10 }
 0x1b1   : > { %p793_p3 = pnand %p796_p0, %p1520_p2 }
 0x1b3   : > { %978 = dma.done.wait (!%p793_p3), %s653_s16, 2048  }
 0x1b4   : > { %980 = vsyncadd (!%p793_p3), %s653_s16, 4294965248  ;;  %s19_s19 = sadd.s32 1, %s1011_s19   ;;  %s1521_s7 = sld [smem:[#allocation8_spill]] }
 0x1b5   : > { %p16_p5 = scmp.ge.s32.totalorder %s19_s19, 6   ;;  %s1522_s24 = sld [smem:[#allocation9_spill]] }
 0x1b6   : > { %s1523_s12 = smov %s987_s13  ;;  %s1524_s13 = smov %s991_s14 }
 0x1b7   : > { %s1525_s14 = smov %s1117_s5  ;;  %s1526_s15 = smov %s1003_s17 }
 0x1b8   : > { %s1527_s16 = smov %s1007_s18  ;;  %18 = sbr.rel (!%p16_p5) target bundleno = 7 (0x7), region = 77 }
 0x1ba   : > { %s1528_s17 = smov %s1521_s7 }
 0x1bb   : > { %s1529_s18 = smov %s1522_s24 }
 0x1bf   :  { %658 = vsyncpa [#allocation3], 1 }
 0x1c0   :  { %660 = vsyncpa [#allocation3 + $0x1], 1 }
 0x1c1   :  { %661 = vsyncpa [#allocation4], 1 }
 0x1c2   :  { %663 = vsyncpa [#allocation4 + $0x1], 1 }

// kernel: tpu_custom_call.1
= control target key start
LH: loop header
LB: loop body
LE: loop exit
PB: predicated region body
PF: predicated region fallthrough
CT: control target
= control target key end

     0   :  { %8 = vsyncpa [#allocation3], 0  ;;  %s1508_s0 = inlined_call_operand.hbm [shape: f32[2,64,300], index: 0, kind: input, shape index: {}]   ;;  %s1509_s1 = inlined_call_operand.vmem [shape: f32[64,64], index: 1, kind: input, shape index: {}]   ;;  %s1510_s2 = inlined_call_operand.vmem [shape: f32[64,1], index: 2, kind: input, shape index: {}]   ;;  %s1511_s3 = inlined_call_operand.hbm [shape: f32[2,64,300], index: 3, kind: output, shape index: {}]  }
   0x1   :  { %10 = vsyncpa [#allocation3 + $0x1], 0 }
   0x2   :  { %11 = vsyncpa [#allocation4], 0 }
   0x3   :  { %13 = vsyncpa [#allocation4 + $0x1], 0  ;;  %s1041_s12 = smov 0   ;;  %s1043_s13 = smov 0  }
   0x4   :  { %s1045_s14 = smov 0   ;;  %s1047_s15 = smov 0  }
   0x5   :  { %s1049_s16 = smov 0   ;;  %s1051_s17 = smov 0  }
   0x6   :  { %s1053_s18 = smov 0   ;;  %s1055_s19 = smov 0  }
   0x7 LB: > { %s727_s20 = sadd.s32 4294967295, %s1011_s19   ;;  %s728_s21 = sadd.s32 4294967294, %s1011_s19   ;;  %s1011_s19 = sphi %s1055_s19, %s19_s19   ;;  %s1007_s18 = sphi %s1053_s18, %s1529_s18   ;;  %s1003_s17 = sphi %s1051_s17, %s1528_s17   ;;  %s999_s16 = sphi %s1049_s16, %s1527_s16   ;;  %s995_s15 = sphi %s1047_s15, %s1526_s15   ;;  %s991_s14 = sphi %s1045_s14, %s1525_s14   ;;  %s987_s13 = sphi %s1043_s13, %s1524_s13   ;;  %s983_s12 = sphi %s1041_s12, %s1523_s12  }
   0x8   : > { %s28_s22 = sadd.s32 1, %s1003_s17  ;;  %s31_s23 = sadd.s32 1, %s1007_s18 }
   0x9   : > { %p29_p0 = scmp.ge.s32.totalorder %s28_s22, 2  ;;  %p47_p1 = scmp.ne.s32.totalorder %s991_s14, %s987_s13 }
   0xa   : > { %p48_p2 = scmp.eq.s32.totalorder %s1011_s19, 0  ;;  %p53_p5 = scmp.ne.s32.totalorder %s987_s13, %s983_s12 }
   0xb   : > { %s1531_s22 = smov (%p29_p0, %s28_s22), 0  ;;  %s1533_s23 = smov (!%p29_p0, %s31_s23), %s1007_s18 }
   0xc   : > { %1514 = sst [smem:[#allocation8_spill]] %s1531_s22  ;;  %s36_s24 = ssub.s32 %s1003_s17, %s1531_s22 }
   0xd   : > { %p1093_p3 = por %p48_p2, %p47_p1  ;;  %p33_p4 = scmp.ge.s32.totalorder %s1533_s23, 2 }
   0xe   : > { %p54_p6 = scmp.eq.s32.totalorder %s727_s20, 0  ;;  %p121_p7 = scmp.eq.s32.totalorder %s727_s20, 3 }
   0xf   : > { %s1535_s23 = smov (%p33_p4, %s1533_s23), 0  ;;  %p127_p10 = scmp.eq.s32.totalorder %s728_s21, 3 }
  0x10   : > { %1516 = sst [smem:[#allocation9_spill]] %s1535_s23  ;;  %p1101_p8 = por %p54_p6, %p53_p5 }
  0x11   : > { %p1105_p9 = por %p121_p7, %p47_p1  ;;  %s35_s28 = ssub.s32 %s1007_s18, %s1535_s23 }
  0x12   : > { %s37_s29 = sor.u32 %s36_s24, %s35_s28  ;;  %s40_s30 = sadd.s32 1, %s991_s14 }
  0x13   : > { %p38_p11 = scmp.eq.s32.totalorder %s37_s29, 0  ;;  %p1112_p12 = por %p127_p10, %p53_p5 }
  0x14   : > { %p730_p13 = scmp.ge.s32.totalorder %s1011_s19, 4 }
  0x15   : > { %s1519_s4 = scalar_select %p1112_p12, 1, 0 }
  0x16   : > { %s1117_s5 = scalar_select %p38_p11, %s991_s14, %s40_s30  }
  0x17   : > { %149 = sbr.rel (%p730_p13) target bundleno = 67 (0x43), region = 24 }
  0x1e   : > { %152 = sbr.rel (!%p1093_p3) target bundleno = 67 (0x43), region = 28  ;;  %s153_s6 = sand.u32 (%p1093_p3), 1, %s991_s14  }
  0x1f   : > { %s732_s7 = sshll.u32 (%p1093_p3), %s1003_s17, 1  ;;  %s731_s8 = sshll.u32 (%p1093_p3), %s153_s6, 7 }
  0x20   : > { %s159_s9 = ssub.s32 (%p1093_p3), 3, %s732_s7  ;;  %s1130_s20 = scalar_lea.sflag (%p1093_p3), [#allocation3], %s153_s6 }
  0x21   : > { %p160_p0 = scmp.lt.s32.totalorder (%p1093_p3), %s159_s9, 2  ;;  %s157_s21 = scalar_lea.vmem (%p1093_p3), [#allocation2], %s731_s8 }
  0x25   : > { %s1537_s9 = smov (!%p160_p0, %s159_s9), 2 }
  0x26   : > { %s1127_s10 = sshll.u32 %s1537_s9, 10 }
  0x27   : > { %s164_s11 = ssub.s32 2048, %s1127_s10 }
  0x28   : > { %165 = vsyncadd %s1130_s20, %s164_s11  ;;  %p734_p1 = scmp.ne.s32.totalorder %s1127_s10, 0  ;;  %s788_s24 = smul.u32 24, %s1007_s18 }
  0x29   : > { %s736_s25 = sshll.u32 %s1537_s9, 3  ;;  %s173_s28 = sshll.u32 %s157_s21, 4  ;;  %s1136_s28 = int_to_ptr.vmem [resolvable:$true] %s173_s28 }
  0x2a   : > { %s168_s29 = sadd.s32 %s788_s24, %s732_s7  ;;  %s889_s7 = scalar_lea.hbm %s1508_s0, 6144 }
  0x2b   : > { %s735_s30 = sshll.u32 %s168_s29, 7 }
  0x2c   : > { %s1141_s6 = scalar_lea.hbm %s1508_s0, %s735_s30 }
  0x2d   : > { %s885_s8 = scalar_lea.hbm %s1141_s6, %s1127_s10  ;;  %p890_p5 = scmp.lt.u32.totalorder %s1141_s6, %s1508_s0 }
  0x2e   : > { %p886_p2 = scmp.ne.s32.totalorder %s1141_s6, %s885_s8  ;;  %p891_p6 = scmp.lt.u32.totalorder %s889_s7, %s885_s8 }
  0x2f   : > { %p893_p10 = scmp.lt.u32.totalorder %s885_s8, %s1141_s6 }
  0x30   : > { %p887_p3 = pnand %p886_p2, %p734_p1  ;;  %p892_p7 = por %p891_p6, %p890_p5 }
  0x32   : > { %p888_p4 = pneg %p887_p3  ;;  %p894_p11 = por %p893_p10, %p892_p7 }
  0x34   : > { %p895_p13 = pnand %p894_p11, %p888_p4 }
  0x36   : > { %898 = shalt.err (!%p895_p13)
}
  0x37   : > { %s899_s22 = scalar_lea.vmem %s1136_s28, %s1127_s10  ;;  %s1013_s23 = smov [#allocation2]  }
  0x38   : > { %p900_p0 = scmp.ne.s32.totalorder %s1136_s28, %s899_s22  ;;  %s903_s30 = sshll.u32 %s1013_s23, 4  ;;  %s904_s30 = int_to_ptr.vmem [resolvable:$false] %s903_s30 }
  0x39   : > { %s905_s11 = scalar_lea.vmem %s904_s30, 4096  ;;  %p906_p12 = scmp.lt.s32.totalorder %s1136_s28, %s904_s30 }
  0x3a   : > { %p901_p2 = pnand %p900_p0, %p734_p1  ;;  %p907_p5 = scmp.lt.s32.totalorder %s905_s11, %s899_s22 }
  0x3c   : > { %p902_p3 = pneg %p901_p2  ;;  %p908_p6 = por %p907_p5, %p906_p12 }
  0x3e   : > { %p909_p7 = pnand %p908_p6, %p902_p3 }
  0x40   : > { %912 = shalt.err (!%p909_p7)
}
  0x41   : > { %s1014_s8 = smov 384   ;;  %s1015_s21 = smov 256  }
  0x42   : > { %179 = dma.hbm_to_vmem [thread:$0]  (%p734_p1), %s1141_s6, %s1127_s10, %s1136_s28, %s1130_s20, %s1014_s8, %s1015_s21, %s736_s25  }
  0x43 PF: > { %p739_p4 = scmp.ge.s32.totalorder %s1011_s19, 1  ;;  %p181_p10 = scmp.lt.s32.totalorder %s1011_s19, 5 }
  0x45   : > { %p182_p12 = pnand %p739_p4, %p181_p10 }
  0x46   : > { %s1173_s7 = sand.u32 (!%p182_p12), 1, %s987_s13  }
  0x47   : > { %185 = sbr.rel (%p182_p12) target bundleno = 430 (0x1ae), region = 32  ;;  %s740_s24 = sshll.u32 (!%p182_p12), %s1173_s7, 7 }
  0x48   : > { %s188_s29 = scalar_lea.sflag (!%p182_p12), [#allocation3], %s1173_s7  ;;  %s1179_s9 = scalar_lea.vmem (!%p182_p12), [#allocation2], %s740_s24 }
  0x4e   : > { %974 = dma.done.wait (%p1101_p8), %s188_s29, 2048  }
  0x4f   : > { %976 = vsyncadd (%p1101_p8), %s188_s29, 4294965248  ;;  %v1016_v0 = vmov 0.0   ;;  %v1017_v1 = vmov 0   ;;  %v1188_v2 = vld [vmem:[%s1179_s9 + $0x8] sm:$0xff]  ;;  %v1191_v3 = vld [vmem:[%s1179_s9 + $0x18] sm:$0xff]  ;;  %vm460_vm8 = vcmask 523264  }
  0x50   : > { %549 = vmatprep.mubr.f32.mxu0 %v1016_v0  ;;  %573 = vmatprep.mubr.f32.mxu1 %v1016_v0  ;;  %v1194_v4 = vld [vmem:[%s1179_s9 + $0x28] sm:$0xff]  ;;  %v249_v5 = vadd.f32 %v1191_v3, %v1188_v2  ;;  %v1199_v6 = vld [vmem:[%s1179_s9] sm:$0xff]  ;;  %v1202_v7 = vld [vmem:[%s1179_s9 + $0x10] sm:$0xff]  ;;  %s1411_s28 = scalar_lea.vmem [#allocation5], %s740_s24  ;;  %s615_s24 = scalar_lea.sflag [#allocation4], %s1173_s7 }
  0x51   : > { %868 = vset.pattern.permute.xlu1 %v1017_v1  ;;  %867 = vset.pattern.permute.xlu0 %v1017_v1  ;;  %v1205_v8 = vld [vmem:[%s1179_s9 + $0x38] sm:$0xff]  ;;  %v1208_v9 = vld [vmem:[%s1179_s9 + $0x20] sm:$0xff]  ;;  %v240_v10 = vadd.f32 %v1202_v7, %v1199_v6  ;;  %v1213_v11 = vld [vmem:[%s1179_s9 + $0x48] sm:$0xff]  ;;  %s751_s6 = sshll.u32 (%p1105_p9), %s995_s15, 1 }
  0x52   : > { %v250_v12 = vadd.f32 %v249_v5, %v1194_v4  ;;  %v1217_v13 = vld [vmem:[%s1179_s9 + $0x30] sm:$0xff]  ;;  %v1220_v14 = vld [vmem:[%s1179_s9 + $0x58] sm:$0xff]  ;;  %v1223_v15 = vld [vmem:[%s1179_s9 + $0x68] sm:$0xff]  ;;  %s623_s22 = ssub.s32 (%p1105_p9), 3, %s751_s6 }
  0x53   : > { %v241_v16 = vadd.f32 %v240_v10, %v1208_v9  ;;  %v267_v17 = vadd.f32 %v1220_v14, %v1213_v11  ;;  %v1229_v18 = vld [vmem:[%s1179_s9 + $0x40] sm:$0xff]  ;;  %v1232_v19 = vld [vmem:[%s1179_s9 + $0x50] sm:$0xff]  ;;  %v1239_v22 = vld [vmem:[%s1179_s9 + $0x78] sm:$0xff]  ;;  %p624_p8 = scmp.lt.s32.totalorder (%p1105_p9), %s623_s22, 2 }
  0x54   : > { %v1235_v20 = vld [vmem:[%s1179_s9 + $0x60] sm:$0xff]  ;;  %v251_v21 = vadd.f32 %v250_v12, %v1205_v8  ;;  %v258_v23 = vadd.f32 %v1232_v19, %v1229_v18  ;;  %v1246_v26 = vld [vmem:[%s1179_s9 + $0x70] sm:$0xff]  ;;  %v415_v37 = vld [vmem:[%s1510_s2 + $0x18] sm:$0xff] }
  0x55   : > { %v242_v24 = vadd.f32 %v241_v16, %v1217_v13  ;;  %v268_v25 = vadd.f32 %v267_v17, %v1223_v15  ;;  %v414_v31 = vld [vmem:[%s1510_s2 + $0x10] sm:$0xff]  ;;  %v412_v32 = vld [vmem:[%s1510_s2] sm:$0xff]  ;;  %v413_v38 = vld [vmem:[%s1510_s2 + $0x8] sm:$0xff] }
  0x56   : > { %v252_v27 = vrot.slane %v251_v21, 4  ;;  %v259_v28 = vadd.f32 %v258_v23, %v1235_v20  ;;  %432 = vperm.xlu1 %868, %v414_v31   ;;  %422 = vperm.xlu0 %867, %v412_v32   ;;  %v417_v47 = vld [vmem:[%s1510_s2 + $0x28] sm:$0xff]  ;;  %v416_v48 = vld [vmem:[%s1510_s2 + $0x20] sm:$0xff]  ;;  %v419_v57 = vld [vmem:[%s1510_s2 + $0x38] sm:$0xff] }
  0x57   : > { %v243_v29 = vrot.slane %v242_v24, 4  ;;  %v269_v30 = vadd.f32 %v268_v25, %v1239_v22  ;;  %v418_v59 = vld [vmem:[%s1510_s2 + $0x30] sm:$0xff] }
  0x58   : > { %v253_v33 = vadd.f32 %v252_v27, %v251_v21  ;;  %v260_v34 = vadd.f32 %v259_v28, %v1246_v26 }
  0x59   : > { %v244_v35 = vadd.f32 %v243_v29, %v242_v24  ;;  %v270_v36 = vrot.slane %v269_v30, 4 }
  0x5a   : > { %v254_v39 = vrot.slane %v253_v33, 2  ;;  %v261_v40 = vrot.slane %v260_v34, 4  ;;  %437 = vperm.xlu1 %868, %v415_v37   ;;  %427 = vperm.xlu0 %867, %v413_v38  }
  0x5b   : > { %v245_v41 = vrot.slane %v244_v35, 2  ;;  %v271_v42 = vadd.f32 %v270_v36, %v269_v30 }
  0x5c   : > { %v255_v43 = vadd.f32 %v254_v39, %v253_v33  ;;  %v262_v44 = vadd.f32 %v261_v40, %v260_v34 }
  0x5d   : > { %v246_v45 = vadd.f32 %v245_v41, %v244_v35  ;;  %v272_v46 = vrot.slane %v271_v42, 2 }
  0x5e   : > { %v256_v49 = vrot.slane %v255_v43, 1  ;;  %v263_v50 = vrot.slane %v262_v44, 2  ;;  %447 = vperm.xlu1 %868, %v417_v47   ;;  %442 = vperm.xlu0 %867, %v416_v48  }
  0x5f   : > { %v247_v51 = vrot.slane %v246_v45, 1  ;;  %v273_v52 = vadd.f32 %v272_v46, %v271_v42 }
  0x60   : > { %v257_v53 = vadd.f32 %v256_v49, %v255_v43  ;;  %v264_v54 = vadd.f32 %v263_v50, %v262_v44 }
  0x61   : > { %v248_v55 = vadd.f32 %v247_v51, %v246_v45  ;;  %v274_v56 = vrot.slane %v273_v52, 1 }
  0x62   : > { %v277_v58 = vmul.f32 0.03125, %v257_v53  ;;  %v265_v62 = vrot.slane %v264_v54, 1  ;;  %457 = vperm.xlu1 %868, %v419_v57   ;;  %452 = vperm.xlu0 %867, %v418_v59  }
  0x63   : > { %v276_v60 = vmul.f32 0.03125, %v248_v55  ;;  %v275_v61 = vadd.f32 %v274_v56, %v273_v52 }
  0x64   : > { %v1276_v63 = vsub.f32 %v1188_v2, %v277_v58  ;;  %v1279_v1 = vsub.f32 %v1191_v3, %v277_v58  ;;  %v1282_v5 = vsub.f32 %v1194_v4, %v277_v58  ;;  %v1285_v10 = vsub.f32 %v1205_v8, %v277_v58 }
  0x65   : > { %v1288_v12 = vsub.f32 %v1199_v6, %v276_v60  ;;  %v1291_v16 = vsub.f32 %v1202_v7, %v276_v60  ;;  %v1294_v17 = vsub.f32 %v1208_v9, %v276_v60  ;;  %v1297_v2 = vsub.f32 %v1217_v13, %v276_v60 }
  0x66   : > { %v297_v3 = vmul.f32 %v1276_v63, %v1276_v63  ;;  %v299_v4 = vmul.f32 %v1279_v1, %v1279_v1  ;;  %v301_v6 = vmul.f32 %v1282_v5, %v1282_v5  ;;  %v303_v13 = vmul.f32 %v1285_v10, %v1285_v10 }
  0x67   : > { %v296_v7 = vmul.f32 %v1288_v12, %v1288_v12  ;;  %v298_v8 = vmul.f32 %v1291_v16, %v1291_v16  ;;  %v300_v9 = vmul.f32 %v1294_v17, %v1294_v17  ;;  %v279_v23 = vmul.f32 0.03125, %v275_v61 }
  0x68   : > { %v321_v21 = vadd.f32 %v299_v4, %v297_v3  ;;  %v266_v24 = vadd.f32 %v265_v62, %v264_v54  ;;  %v302_v25 = vmul.f32 %v1297_v2, %v1297_v2 }
  0x69   : > { %v312_v27 = vadd.f32 %v298_v8, %v296_v7  ;;  %v1316_v29 = vsub.f32 %v1213_v11, %v279_v23  ;;  %v1319_v30 = vsub.f32 %v1220_v14, %v279_v23  ;;  %v1322_v31 = vsub.f32 %v1223_v15, %v279_v23 }
  0x6a   : > { %v322_v28 = vadd.f32 %v321_v21, %v301_v6  ;;  %v1325_v33 = vsub.f32 %v1239_v22, %v279_v23  ;;  %v278_v34 = vmul.f32 0.03125, %v266_v24 }
  0x6b   : > { %v313_v32 = vadd.f32 %v312_v27, %v300_v9  ;;  %v305_v36 = vmul.f32 %v1316_v29, %v1316_v29  ;;  %v307_v37 = vmul.f32 %v1319_v30, %v1319_v30  ;;  %v309_v11 = vmul.f32 %v1322_v31, %v1322_v31 }
  0x6c   : > { %v323_v35 = vadd.f32 %v322_v28, %v303_v13  ;;  %v311_v15 = vmul.f32 %v1325_v33, %v1325_v33  ;;  %v1336_v38 = vsub.f32 %v1229_v18, %v278_v34  ;;  %v1339_v22 = vsub.f32 %v1232_v19, %v278_v34 }
  0x6d   : > { %v314_v14 = vadd.f32 %v313_v32, %v302_v25  ;;  %v339_v40 = vadd.f32 %v307_v37, %v305_v36  ;;  %v1342_v41 = vsub.f32 %v1235_v20, %v278_v34  ;;  %v1345_v42 = vsub.f32 %v1246_v26, %v278_v34 }
  0x6e   : > { %v324_v39 = vrot.slane %v323_v35, 4  ;;  %v304_v44 = vmul.f32 %v1336_v38, %v1336_v38  ;;  %v306_v45 = vmul.f32 %v1339_v22, %v1339_v22 }
  0x6f   : > { %v315_v43 = vrot.slane %v314_v14, 4  ;;  %v340_v46 = vadd.f32 %v339_v40, %v309_v11  ;;  %v308_v19 = vmul.f32 %v1342_v41, %v1342_v41  ;;  %v310_v20 = vmul.f32 %v1345_v42, %v1345_v42 }
  0x70   : > { %v325_v18 = vadd.f32 %v324_v39, %v323_v35  ;;  %v330_v48 = vadd.f32 %v306_v45, %v304_v44 }
  0x71   : > { %v316_v47 = vadd.f32 %v315_v43, %v314_v14  ;;  %v341_v26 = vadd.f32 %v340_v46, %v311_v15 }
  0x72   : > { %v326_v49 = vrot.slane %v325_v18, 2  ;;  %v331_v51 = vadd.f32 %v330_v48, %v308_v19 }
  0x73   : > { %v317_v50 = vrot.slane %v316_v47, 2  ;;  %v342_v53 = vrot.slane %v341_v26, 4 }
  0x74   : > { %v327_v52 = vadd.f32 %v326_v49, %v325_v18  ;;  %v332_v55 = vadd.f32 %v331_v51, %v310_v20 }
  0x75   : > { %v318_v54 = vadd.f32 %v317_v50, %v316_v47  ;;  %v343_v57 = vadd.f32 %v342_v53, %v341_v26 }
  0x76   : > { %v328_v56 = vrot.slane %v327_v52, 1  ;;  %v333_v59 = vrot.slane %v332_v55, 4 }
  0x77   : > { %v319_v58 = vrot.slane %v318_v54, 1  ;;  %v344_v61 = vrot.slane %v343_v57, 2 }
  0x78   : > { %v329_v60 = vadd.f32 %v328_v56, %v327_v52  ;;  %v334_v3 = vadd.f32 %v333_v59, %v332_v55 }
  0x79   : > { %v320_v62 = vadd.f32 %v319_v58, %v318_v54  ;;  %v345_v6 = vadd.f32 %v344_v61, %v343_v57 }
  0x7a   : > { %v349_v4 = vmul.f32 0.03125, %v329_v60  ;;  %v335_v8 = vrot.slane %v334_v3, 2 }
  0x7b   : > { %v348_v7 = vmul.f32 0.03125, %v320_v62  ;;  %v346_v9 = vrot.slane %v345_v6, 1 }
  0x7c   : > { %869 = vrsqrt.f32 %v349_v4  ;;  %v336_v13 = vadd.f32 %v335_v8, %v334_v3  ;;  %vm361_vm0 = vcmp.eq.f32.partialorder %v349_v4, inf  ;;  %vm363_vm1 = vcmp.eq.f32.partialorder %v349_v4, 0.0 }
  0x7d   : > { %871 = vrsqrt.f32 %v348_v7  ;;  %v347_v21 = vadd.f32 %v346_v9, %v345_v6  ;;  %v364_v32 = vand.u32 2147483648, %v349_v4  ;;  %vm354_vm2 = vcmp.eq.f32.partialorder %v348_v7, inf }
  0x7e   : > { %v337_v23 = vrot.slane %v336_v13, 1  ;;  %v357_v36 = vand.u32 2147483648, %v348_v7  ;;  %vm356_vm3 = vcmp.eq.f32.partialorder %v348_v7, 0.0 }
  0x7f   : > { %v351_v24 = vmul.f32 0.03125, %v347_v21  ;;  %v407_v21 = vld [vmem:[%s1509_s1 + $0x18] sm:$0xff] }
  0x80   : > { %v338_v25 = vadd.f32 %v337_v23, %v336_v13  ;;  %v411_v23 = vld [vmem:[%s1509_s1 + $0x38] sm:$0xff] }
  0x81   : > { %873 = vrsqrt.f32 %v351_v24  ;;  %vm375_vm4 = vcmp.eq.f32.partialorder %v351_v24, inf  ;;  %v378_v45 = vand.u32 2147483648, %v351_v24  ;;  %vm377_vm5 = vcmp.eq.f32.partialorder %v351_v24, 0.0 }
  0x82   : > { %v350_v27 = vmul.f32 0.03125, %v338_v25 }
  0x84   : > { %875 = vrsqrt.f32 %v350_v27  ;;  %vm368_vm6 = vcmp.eq.f32.partialorder %v350_v27, inf  ;;  %v371_v47 = vand.u32 2147483648, %v350_v27  ;;  %vm370_vm7 = vcmp.eq.f32.partialorder %v350_v27, 0.0 }
  0x86   : > { %v870_v28 = vpop.eup %869 }
  0x87   : > { %v872_v34 = vpop.eup %871  ;;  %v360_v35 = vmul.f32 %v870_v28, %v349_v4 }
  0x88   : > { %v353_v37 = vmul.f32 %v872_v34, %v348_v7 }
  0x89   : > { %v362_v11 = vsel %vm361_vm0, %v349_v4, %v360_v35 }
  0x8a   : > { %v365_v14 = vsel %vm363_vm1, %v364_v32, %v362_v11  ;;  %v355_v15 = vsel %vm354_vm2, %v348_v7, %v353_v37 }
  0x8b   : > { %v381_v39 = vadd.f32 1e-05, %v365_v14  ;;  %v358_v40 = vsel %vm356_vm3, %v357_v36, %v355_v15  ;;  %v874_v44 = vpop.eup %873 }
  0x8c   : > { %v380_v43 = vadd.f32 1e-05, %v358_v40  ;;  %v374_v18 = vmul.f32 %v874_v44, %v351_v24 }
  0x8d   : > { %877 = vrcp.f32 %v381_v39 }
  0x8e   : > { %879 = vrcp.f32 %v380_v43  ;;  %v876_v46 = vpop.eup %875  ;;  %v376_v19 = vsel %vm375_vm4, %v351_v24, %v374_v18 }
  0x8f   : > { %v379_v20 = vsel %vm377_vm5, %v378_v45, %v376_v19  ;;  %v367_v48 = vmul.f32 %v876_v46, %v350_v27 }
  0x90   : > { %v383_v49 = vadd.f32 1e-05, %v379_v20 }
  0x91   : > { %v369_v26 = vsel %vm368_vm6, %v350_v27, %v367_v48 }
  0x92   : > { %881 = vrcp.f32 %v383_v49  ;;  %v372_v50 = vsel %vm370_vm7, %v371_v47, %v369_v26 }
  0x93   : > { %v382_v51 = vadd.f32 1e-05, %v372_v50 }
  0x95   : > { %883 = vrcp.f32 %v382_v51 }
  0x97   : > { %v878_v52 = vpop.eup %877 }
  0x98   : > { %v880_v53 = vpop.eup %879  ;;  %v389_v54 = vmul.f32 %v878_v52, %v1276_v63  ;;  %v391_v55 = vmul.f32 %v878_v52, %v1279_v1  ;;  %v393_v56 = vmul.f32 %v878_v52, %v1282_v5  ;;  %v395_v57 = vmul.f32 %v878_v52, %v1285_v10 }
  0x99   : > { %v388_v58 = vmul.f32 %v880_v53, %v1288_v12  ;;  %v390_v59 = vmul.f32 %v880_v53, %v1291_v16  ;;  %v392_v60 = vmul.f32 %v880_v53, %v1294_v17  ;;  %v394_v61 = vmul.f32 %v880_v53, %v1297_v2 }
  0x9a   : > { %v764_v62 = vpack.c.bf16 %v391_v55, %v389_v54  ;;  %v768_v3 = vpack.c.bf16 %v395_v57, %v393_v56 }
  0x9b   : > { %v766_v4 = vpack.c.bf16 %v390_v59, %v388_v58  ;;  %v770_v63 = vpack.c.bf16 %v394_v61, %v392_v60 }
  0x9c   : > { %765 = vmatprep.subr.bf16.mxu0 %v764_v62  ;;  %780 = vmatprep.subr.bf16.mxu1 %v764_v62  ;;  %v882_v1 = vpop.eup %881 }
  0x9d   : > { %767 = vmatpush1.bf16.msra.mxu0 %v766_v4  ;;  %784 = vmatpush1.bf16.msra.mxu1 %v766_v4  ;;  %v397_v5 = vmul.f32 %v882_v1, %v1316_v29  ;;  %v399_v10 = vmul.f32 %v882_v1, %v1319_v30  ;;  %v401_v16 = vmul.f32 %v882_v1, %v1322_v31  ;;  %v404_v31 = vld [vmem:[%s1509_s1] sm:$0xff] }
  0x9e   : > { %769 = vmatprep.subr.bf16.mxu0 %v768_v3  ;;  %781 = vmatprep.subr.bf16.mxu1 %v768_v3  ;;  %v403_v17 = vmul.f32 %v882_v1, %v1325_v33  ;;  %v408_v33 = vld [vmem:[%s1509_s1 + $0x20] sm:$0xff] }
  0x9f   : > { %v772_v12 = vpack.c.bf16 %v399_v10, %v397_v5  ;;  %v884_v2 = vpop.eup %883 }
  0xa0   : > { %v396_v6 = vmul.f32 %v884_v2, %v1336_v38  ;;  %v398_v7 = vmul.f32 %v884_v2, %v1339_v22  ;;  %v400_v8 = vmul.f32 %v884_v2, %v1342_v41  ;;  %v402_v29 = vmul.f32 %v884_v2, %v1345_v42  ;;  %v405_v38 = vld [vmem:[%s1509_s1 + $0x8] sm:$0xff]  ;;  %v406_v41 = vld [vmem:[%s1509_s1 + $0x10] sm:$0xff] }
  0xa1   : > { %771 = vmatpush1.bf16.msra.mxu0 %v770_v63  ;;  %785 = vmatpush1.bf16.msra.mxu1 %v770_v63  ;;  %v776_v9 = vpack.c.bf16 %v403_v17, %v401_v16  ;;  %v409_v22 = vld [vmem:[%s1509_s1 + $0x28] sm:$0xff]  ;;  %v410_v42 = vld [vmem:[%s1509_s1 + $0x30] sm:$0xff] }
  0xa2   : > { %773 = vmatprep.subr.bf16.mxu0 %v772_v12  ;;  %782 = vmatprep.subr.bf16.mxu1 %v772_v12  ;;  %v774_v30 = vpack.c.bf16 %v398_v7, %v396_v6  ;;  %v778_v13 = vpack.c.bf16 %v402_v29, %v400_v8 }
  0xa5   : > { %775 = vmatpush1.bf16.msra.mxu0 %v774_v30  ;;  %786 = vmatpush1.bf16.msra.mxu1 %v774_v30 }
  0xa6   : > { %777 = vmatprep.subr.bf16.mxu0 %v776_v9  ;;  %783 = vmatprep.subr.bf16.mxu1 %v776_v9 }
  0xa9   : > { %779 = vmatpush1.bf16.msra.mxu0 %v778_v13  ;;  %787 = vmatpush1.bf16.msra.mxu1 %v778_v13 }
  0xac   : > { %742 = vmatmul.mubr.msk.f32.vlgmr.msra.gmra.mrb[0].mxu0 %vm460_vm8, %v404_v31  ;;  %746 = vmatmul.mubr.msk.f32.vlgmr.msra.gmra.mrb[0].mxu1 %vm460_vm8, %v408_v33 }
  0xad   : > { %555 = vmatprep.mubr.f32.mxu0 %v1016_v0  ;;  %579 = vmatprep.mubr.f32.mxu1 %v1016_v0 }
  0xb0   : > { %743 = vmatmul.mubr.msk.f32.gmra.mrb[2].mxu0 %vm460_vm8, %v405_v38  ;;  %747 = vmatmul.mubr.msk.f32.gmra.mrb[2].mxu1 %vm460_vm8, %v409_v22 }
  0xb1   : > { %561 = vmatprep.mubr.f32.mxu0 %v1016_v0  ;;  %585 = vmatprep.mubr.f32.mxu1 %v1016_v0 }
  0xb4   : > { %744 = vmatmul.mubr.msk.f32.gmra.mrb[4].mxu0 %vm460_vm8, %v406_v41  ;;  %748 = vmatmul.mubr.msk.f32.gmra.mrb[4].mxu1 %vm460_vm8, %v410_v42 }
  0xb5   : > { %567 = vmatprep.mubr.f32.mxu0 %v1016_v0  ;;  %591 = vmatprep.mubr.f32.mxu1 %v1016_v0 }
  0xb8   : > { %745 = vmatmul.mubr.msk.f32.gmra.mrb[6].mxu0 %vm460_vm8, %v407_v21  ;;  %749 = vmatmul.mubr.msk.f32.gmra.mrb[6].mxu1 %vm460_vm8, %v411_v23 }
  0xd5   : > { %v423_v24 = vpop.permute.xlu0 %422  ;;  %v433_v25 = vpop.permute.xlu1 %432 }
  0xd9   : > { %v428_v27 = vpop.permute.xlu0 %427  ;;  %v438_v28 = vpop.permute.xlu1 %437 }
  0xdd   : > { %v443_v32 = vpop.permute.xlu0 %442  ;;  %v448_v39 = vpop.permute.xlu1 %447 }
  0xe1   : > { %v453_v20 = vpop.permute.xlu0 %452  ;;  %v458_v55 = vpop.permute.xlu1 %457 }
 0x17f   : > { %v551_v34 = vpop.f32.mrb[0].mxu0  ;;  %v575_v0 = vpop.f32.mrb[0].mxu1 }
 0x180   : > { %v552_v35 = vadd.f32 %v551_v34, %v423_v24  ;;  %v576_v36 = vadd.f32 %v575_v0, %v443_v32  ;;  %v553_v37 = vpop.f32.mrb[1].mxu0  ;;  %v577_v11 = vpop.f32.mrb[1].mxu1 }
 0x181   : > { %v554_v14 = vadd.f32 %v553_v37, %v423_v24  ;;  %v578_v15 = vadd.f32 %v577_v11, %v443_v32 }
 0x182   : > { %598 = vst [vmem:[%s1411_s28] sm:$0xff] %v552_v35  ;;  %606 = vst [vmem:[%s1411_s28 + $0x40] sm:$0xff] %v576_v36 }
 0x183   : > { %599 = vst [vmem:[%s1411_s28 + $0x8] sm:$0xff] %v554_v14  ;;  %607 = vst [vmem:[%s1411_s28 + $0x48] sm:$0xff] %v578_v15  ;;  %v557_v40 = vpop.f32.mrb[2].mxu0  ;;  %v581_v43 = vpop.f32.mrb[2].mxu1 }
 0x184   : > { %v558_v44 = vadd.f32 %v557_v40, %v428_v27  ;;  %v582_v45 = vadd.f32 %v581_v43, %v448_v39  ;;  %v559_v18 = vpop.f32.mrb[3].mxu0  ;;  %v583_v46 = vpop.f32.mrb[3].mxu1 }
 0x185   : > { %v560_v19 = vadd.f32 %v559_v18, %v428_v27  ;;  %v584_v47 = vadd.f32 %v583_v46, %v448_v39 }
 0x186   : > { %600 = vst [vmem:[%s1411_s28 + $0x10] sm:$0xff] %v558_v44  ;;  %608 = vst [vmem:[%s1411_s28 + $0x50] sm:$0xff] %v582_v45 }
 0x187   : > { %601 = vst [vmem:[%s1411_s28 + $0x18] sm:$0xff] %v560_v19  ;;  %609 = vst [vmem:[%s1411_s28 + $0x58] sm:$0xff] %v584_v47  ;;  %v563_v48 = vpop.f32.mrb[4].mxu0  ;;  %v587_v49 = vpop.f32.mrb[4].mxu1 }
 0x188   : > { %v564_v26 = vadd.f32 %v563_v48, %v433_v25  ;;  %v588_v50 = vadd.f32 %v587_v49, %v453_v20  ;;  %v565_v51 = vpop.f32.mrb[5].mxu0  ;;  %v589_v52 = vpop.f32.mrb[5].mxu1 }
 0x189   : > { %v566_v53 = vadd.f32 %v565_v51, %v433_v25  ;;  %v590_v54 = vadd.f32 %v589_v52, %v453_v20  ;;  %621 = sbr.rel (!%p1105_p9) target bundleno = 430 (0x1ae), region = 40 }
 0x18a   : > { %602 = vst [vmem:[%s1411_s28 + $0x20] sm:$0xff] %v564_v26  ;;  %610 = vst [vmem:[%s1411_s28 + $0x60] sm:$0xff] %v588_v50 }
 0x18b   : > { %603 = vst [vmem:[%s1411_s28 + $0x28] sm:$0xff] %v566_v53  ;;  %611 = vst [vmem:[%s1411_s28 + $0x68] sm:$0xff] %v590_v54  ;;  %v569_v56 = vpop.f32.mrb[6].mxu0  ;;  %v593_v57 = vpop.f32.mrb[6].mxu1 }
 0x18c   : > { %v570_v58 = vadd.f32 %v569_v56, %v438_v28  ;;  %v594_v59 = vadd.f32 %v593_v57, %v458_v55  ;;  %v571_v60 = vpop.f32.mrb[7].mxu0  ;;  %v595_v61 = vpop.f32.mrb[7].mxu1 }
 0x18d   : > { %v572_v62 = vadd.f32 %v571_v60, %v438_v28  ;;  %v596_v3 = vadd.f32 %v595_v61, %v458_v55 }
 0x18e   : > { %604 = vst [vmem:[%s1411_s28 + $0x30] sm:$0xff] %v570_v58  ;;  %612 = vst [vmem:[%s1411_s28 + $0x70] sm:$0xff] %v594_v59 }
 0x18f   : > { %605 = vst [vmem:[%s1411_s28 + $0x38] sm:$0xff] %v572_v62  ;;  %613 = vst [vmem:[%s1411_s28 + $0x78] sm:$0xff] %v596_v3 }
 0x190   : > { %s1539_s22 = smov (!%p624_p8, %s623_s22), 2 }
 0x191   : > { %s1436_s23 = sshll.u32 %s1539_s22, 10 }
 0x192   : > { %s628_s30 = ssub.s32 2048, %s1436_s23 }
 0x193   : > { %629 = vsyncadd %s615_s24, %s628_s30  ;;  %p753_p9 = scmp.ne.s32.totalorder %s1436_s23, 0  ;;  %s789_s27 = smul.u32 24, %s999_s16 }
 0x194   : > { %s755_s15 = sshll.u32 %s1539_s22, 3  ;;  %s637_s11 = sshll.u32 %s1411_s28, 4  ;;  %s1445_s11 = int_to_ptr.vmem [resolvable:$true] %s637_s11 }
 0x195   : > { %s632_s8 = sadd.s32 %s789_s27, %s751_s6  ;;  %s913_s10 = scalar_lea.vmem %s1445_s11, %s1436_s23 }
 0x196   : > { %s754_s21 = sshll.u32 %s632_s8, 7  ;;  %p914_p1 = scmp.ne.s32.totalorder %s1445_s11, %s913_s10 }
 0x197   : > { %s1450_s26 = scalar_lea.hbm %s1511_s3, %s754_s21  ;;  %s1018_s16 = smov [#allocation5]  }
 0x198   : > { %p915_p11 = pnand %p914_p1, %p753_p9  ;;  %s917_s20 = sshll.u32 %s1018_s16, 4  ;;  %s918_s20 = int_to_ptr.vmem [resolvable:$false] %s917_s20 }
 0x199   : > { %s919_s25 = scalar_lea.vmem %s918_s20, 4096  ;;  %p920_p0 = scmp.lt.s32.totalorder %s1445_s11, %s918_s20 }
 0x19a   : > { %p916_p13 = pneg %p915_p11  ;;  %p921_p2 = scmp.lt.s32.totalorder %s919_s25, %s913_s10 }
 0x19c   : > { %p922_p3 = por %p921_p2, %p920_p0 }
 0x19e   : > { %p923_p5 = pnand %p922_p3, %p916_p13 }
 0x1a0   : > { %926 = shalt.err (!%p923_p5)
}
 0x1a1   : > { %s927_s28 = scalar_lea.hbm %s1450_s26, %s1436_s23  ;;  %s931_s27 = scalar_lea.hbm %s1511_s3, 6144 }
 0x1a2   : > { %p928_p6 = scmp.ne.s32.totalorder %s1450_s26, %s927_s28  ;;  %p932_p10 = scmp.lt.u32.totalorder %s1450_s26, %s1511_s3 }
 0x1a3   : > { %p933_p12 = scmp.lt.u32.totalorder %s931_s27, %s927_s28  ;;  %p935_p1 = scmp.lt.u32.totalorder %s927_s28, %s1450_s26 }
 0x1a4   : > { %p929_p7 = pnand %p928_p6, %p753_p9 }
 0x1a5   : > { %p934_p8 = por %p933_p12, %p932_p10 }
 0x1a6   : > { %p930_p4 = pneg %p929_p7 }
 0x1a7   : > { %p936_p11 = por %p935_p1, %p934_p8 }
 0x1a9   : > { %p937_p13 = pnand %p936_p11, %p930_p4 }
 0x1ab   : > { %940 = shalt.err (!%p937_p13)
}
 0x1ac   : > { %s1019_s29 = smov 256   ;;  %s1020_s9 = smov 384  }
 0x1ad   : > { %643 = dma.vmem_to_hbm [thread:$0]  (%p753_p9), %s1445_s11, %s1436_s23, %s1450_s26, %s615_s24, %s1019_s29, %s1020_s9, %s755_s15  }
 0x1ae PF: > { %p796_p0 = scmp.ge.s32.totalorder %s1011_s19, 2  ;;  %s652_s10 = sand.u32 1, %s983_s12  }
 0x1af   : > { %p1520_p2 = scmp.ne.s32.totalorder %s1519_s4, 0  ;;  %s653_s16 = scalar_lea.sflag [#allocation4], %s652_s10 }
 0x1b1   : > { %p793_p3 = pnand %p796_p0, %p1520_p2 }
 0x1b3   : > { %978 = dma.done.wait (!%p793_p3), %s653_s16, 2048  }
 0x1b4   : > { %980 = vsyncadd (!%p793_p3), %s653_s16, 4294965248  ;;  %s19_s19 = sadd.s32 1, %s1011_s19   ;;  %s1521_s7 = sld [smem:[#allocation8_spill]] }
 0x1b5   : > { %p16_p5 = scmp.ge.s32.totalorder %s19_s19, 6   ;;  %s1522_s24 = sld [smem:[#allocation9_spill]] }
 0x1b6   : > { %s1523_s12 = smov %s987_s13  ;;  %s1524_s13 = smov %s991_s14 }
 0x1b7   : > { %s1525_s14 = smov %s1117_s5  ;;  %s1526_s15 = smov %s1003_s17 }
 0x1b8   : > { %s1527_s16 = smov %s1007_s18  ;;  %18 = sbr.rel (!%p16_p5) target bundleno = 7 (0x7), region = 77 }
 0x1ba   : > { %s1528_s17 = smov %s1521_s7 }
 0x1bb   : > { %s1529_s18 = smov %s1522_s24 }
 0x1bf   :  { %658 = vsyncpa [#allocation3], 1 }
 0x1c0   :  { %660 = vsyncpa [#allocation3 + $0x1], 1 }
 0x1c1   :  { %661 = vsyncpa [#allocation4], 1 }
 0x1c2   :  { %663 = vsyncpa [#allocation4 + $0x1], 1 }

</bundles_post_ra>
